<compile_context>
chip_gen: v7x
topology: tpu7x:2x2x1
jax: 0.10.0
libtpu: 0.0.40
codegen_flags: <defaults>
</compile_context>

<pallas_src>
import math
import functools

import jax
import jax.numpy as jnp
from jax import lax
from jax.experimental import pallas as pl
from jax.experimental.pallas import tpu as pltpu

WEIGHT_DTYPE = jnp.bfloat16   # weight matrices only; biases / LN params stay f32


# ---------------------------------------------------------------------------
# Fused decoder-layer kernel (one grid step = one batch block)
# ---------------------------------------------------------------------------

def decoder_layer_kernel(
    tgt_ref, mem_ref, mask_ref,
    wq1_ref, wkv1_ref, wo1_ref,
    wq2_ref, wkv2_ref, wo2_ref,
    w1_ref, w2_ref,
    bqkv_ref, b1_ref, vecs_ref,
    out_ref, *, dim_qk, eps):

    f32 = jnp.float32
    bblk, T, D = tgt_ref.shape
    S = mem_ref.shape[1]
    HQ = wq1_ref.shape[1]
    scale = 1.0 / math.sqrt(dim_qk)
    head_mask = mask_ref[...]                    # (HQ, HQ) block-diag over heads

    def wdot(a, w_ref):
        # bf16 at the MXU input (native path), f32 accumulation.
        return jnp.dot(a.astype(w_ref.dtype), w_ref[...],
                       preferred_element_type=f32)

    def vrow(i):
        # packed (1, D) bias / LayerNorm row (f32)
        return vecs_ref[i:i + 1, :]

    def add_ln(x, y, g_row, b_row):
        # LayerNorm(x + y): one pass (mean & mean-of-squares), fused gamma/beta.
        z = x + y
        m = jnp.mean(z, axis=-1, keepdims=True)
        ms = jnp.mean(z * z, axis=-1, keepdims=True)
        sc = lax.rsqrt(ms - m * m + eps) * vrow(g_row)
        return z * sc + (vrow(b_row) - m * sc)

    def mha(q2d, kv2d, n_kv, wq_ref, wkv_ref, wo_ref, attn_idx, bo_row):
        bq = bqkv_ref[attn_idx:attn_idx + 1, 0:HQ]
        bkv = bqkv_ref[attn_idx:attn_idx + 1, HQ:3 * HQ]
        # Wide projections on flattened (bblk*rows, D); 1/sqrt(dqk) folded into
        # Q after the bias, matching the reference.
        qp = (wdot(q2d, wq_ref) + bq) * scale                  # (bblk*T, HQ)
        kvp = wdot(kv2d, wkv_ref) + bkv                        # (bblk*n_kv, 2HQ)
        ctx = []
        for b in range(bblk):                                  # static, bblk small
            qp_b = qp[b * T:(b + 1) * T, :]
            kp_b = kvp[b * n_kv:(b + 1) * n_kv, 0:HQ]
            vp_b = kvp[b * n_kv:(b + 1) * n_kv, HQ:2 * HQ]
            # Softmax-free attention, reassociated:  ctx_h = q_h (k_h^T v_h),
            # done full-width with a block-diagonal per-head mask (exact).
            m_kv = jnp.dot(kp_b.T, vp_b, preferred_element_type=f32) * head_mask
            ctx.append(jnp.dot(qp_b, m_kv, preferred_element_type=f32))
        ctx2d = jnp.concatenate(ctx, axis=0) if bblk > 1 else ctx[0]
        # ONE K=HQ output projection for all heads (no per-head N=8 matmuls).
        return wdot(ctx2d, wo_ref) + vrow(bo_row)

    x = tgt_ref[...].astype(f32).reshape(bblk * T, D)     # residual & q=k=v (attn1)
    mem = mem_ref[...].astype(f32).reshape(bblk * S, D)   # k=v for attn2

    # sub-layer 1: self-attention + residual + LayerNorm
    x = add_ln(x, mha(x, x, T, wq1_ref, wkv1_ref, wo1_ref, 0, 0), 1, 2)
    # sub-layer 2: cross-attention + residual + LayerNorm
    x = add_ln(x, mha(x, mem, S, wq2_ref, wkv2_ref, wo2_ref, 1, 3), 4, 5)
    # sub-layer 3: feed-forward + residual + LayerNorm
    h = jnp.maximum(wdot(x, w1_ref) + b1_ref[...], 0.0)
    ff = wdot(h, w2_ref) + vrow(6)
    out_ref[...] = add_ln(x, ff, 7, 8).reshape(bblk, T, D)


# ---------------------------------------------------------------------------
# pallas_call wrapper
# ---------------------------------------------------------------------------

def _full_spec(shape):
    # whole-array block, replicated across the (batch-block) grid
    return pl.BlockSpec(shape, lambda b: (0,) * len(shape))


def decoder_layer(tgt, memory, params, num_heads, eps=1e-5, batch_block=None):
    B, T, D = tgt.shape
    S = memory.shape[1]
    p1, p2, pf = params["attn1"], params["attn2"], params["ff"]
    ln1, ln2, ln3 = params["ln1"], params["ln2"], params["ln3"]
    HQ = p1["wq"].shape[1]
    FF = pf["w1"].shape[1]
    dim_qk = HQ // num_heads

    bblk = B if batch_block is None else batch_block
    assert B % bblk == 0, "batch must be divisible by the batch block"

    # block-diagonal per-head mask for the reassociated (softmax-free) attention
    hid = jnp.arange(HQ, dtype=jnp.int32) // dim_qk
    head_mask = (hid[:, None] == hid[None, :]).astype(jnp.float32)

    # pack the small vectors: 2 projection-bias rows + 9 (D,)-wide rows
    bqkv = jnp.stack([jnp.concatenate([p1["bq"], p1["bkv"]]),
                      jnp.concatenate([p2["bq"], p2["bkv"]])])         # (2, 3HQ)
    vecs = jnp.stack([p1["bo"], ln1["gamma"], ln1["beta"],
                      p2["bo"], ln2["gamma"], ln2["beta"],
                      pf["b2"], ln3["gamma"], ln3["beta"]])            # (9, D)
    b1 = pf["b1"][None, :]                                             # (1, FF)

    flat_inputs = [tgt, memory, head_mask,
                   p1["wq"], p1["wkv"], p1["wo"],
                   p2["wq"], p2["wkv"], p2["wo"],
                   pf["w1"], pf["w2"],
                   bqkv, b1, vecs]

    in_specs = [
        pl.BlockSpec((bblk, T, D), lambda b: (b, 0, 0)),   # tgt  (per batch block)
        pl.BlockSpec((bblk, S, D), lambda b: (b, 0, 0)),   # memory
    ] + [_full_spec(a.shape) for a in flat_inputs[2:]]     # grid-invariant params

    # advisory cost estimate so XLA can overlap this call with surrounding ops
    nbytes = lambda a: int(a.size) * a.dtype.itemsize
    bytes_accessed = sum(nbytes(a) for a in flat_inputs) + B * T * D * 4
    flops = 2 * B * (
        T * D * HQ + T * D * 2 * HQ + T * HQ * HQ + T * HQ * HQ + T * HQ * D     # attn1
        + T * D * HQ + S * D * 2 * HQ + S * HQ * HQ + T * HQ * HQ + T * HQ * D   # attn2
        + T * D * FF + T * FF * D)                                               # FFN
    cost = pl.CostEstimate(flops=flops, transcendentals=3 * B * T,
                           bytes_accessed=bytes_accessed)

    # scoped-VMEM budget sized from the resident set (double-buffered blocks)
    block_bytes = (2 * bblk * T * D * 4 + bblk * S * D * 4
                   + sum(nbytes(a) for a in flat_inputs[2:]))
    vmem_limit = int(2 * block_bytes) + (8 << 20)

    kernel = functools.partial(decoder_layer_kernel, dim_qk=dim_qk, eps=eps)
    return pl.pallas_call(
        kernel,
        out_shape=jax.ShapeDtypeStruct((B, T, D), jnp.float32),
        grid=(B // bblk,),
        in_specs=in_specs,
        out_specs=pl.BlockSpec((bblk, T, D), lambda b: (b, 0, 0)),
        compiler_params=pltpu.CompilerParams(
            # NOTE: batch-parallel duplicates the grid-invariant weight DMA per
            # core on v7x; at production prefer a sequence-tile parallel axis.
            dimension_semantics=("parallel",),
            vmem_limit_bytes=vmem_limit),
        cost_estimate=cost,
    )(*flat_inputs)


# ---------------------------------------------------------------------------
# Parameter init (deterministic, PyTorch-Linear-like uniform), packed layout:
#   wq: (D, H*dqk), wkv = [Wk|Wv]: (D, 2*H*dqk), wo: (H*dqk, D)   [bf16]
#   bq: (H*dqk,), bkv = [bk|bv]: (2*H*dqk,), bo/gamma/beta/b*: (dim,)  [f32]
# ---------------------------------------------------------------------------

def _init_linear(key, fan_in, fan_out):
    kw, kb = jax.random.split(key)
    bound = 1.0 / math.sqrt(fan_in)
    w = jax.random.uniform(kw, (fan_in, fan_out), jnp.float32, -bound, bound)
    b = jax.random.uniform(kb, (fan_out,), jnp.float32, -bound, bound)
    return w, b


def init_mha_params(key, num_heads, dim_in, dim_qk):
    keys = jax.random.split(key, 3 * num_heads + 1)
    wq, bq, wk, bk, wv, bv = [], [], [], [], [], []
    for h in range(num_heads):
        w, b = _init_linear(keys[3 * h + 0], dim_in, dim_qk); wq.append(w); bq.append(b)
        w, b = _init_linear(keys[3 * h + 1], dim_in, dim_qk); wk.append(w); bk.append(b)
        w, b = _init_linear(keys[3 * h + 2], dim_in, dim_qk); wv.append(w); bv.append(b)
    wo, bo = _init_linear(keys[-1], num_heads * dim_qk, dim_in)
    wq = jnp.concatenate(wq, axis=1)
    wkv = jnp.concatenate([jnp.concatenate(wk, axis=1),
                           jnp.concatenate(wv, axis=1)], axis=1)
    return {"wq": wq.astype(WEIGHT_DTYPE), "wkv": wkv.astype(WEIGHT_DTYPE),
            "wo": wo.astype(WEIGHT_DTYPE),
            "bq": jnp.concatenate(bq), "bkv": jnp.concatenate(bk + bv), "bo": bo}


def init_ln_params(dim):
    return {"gamma": jnp.ones((dim,), jnp.float32),
            "beta": jnp.zeros((dim,), jnp.float32)}


def init_ffn_params(key, dim_model, dim_ff):
    k1, k2 = jax.random.split(key)
    w1, b1 = _init_linear(k1, dim_model, dim_ff)
    w2, b2 = _init_linear(k2, dim_ff, dim_model)
    return {"w1": w1.astype(WEIGHT_DTYPE), "b1": b1,
            "w2": w2.astype(WEIGHT_DTYPE), "b2": b2}


def init_decoder_layer(key, dim_model, num_heads, dim_ff):
    dim_qk = max(dim_model // num_heads, 1)
    k1, k2, k3 = jax.random.split(key, 3)
    return {"attn1": init_mha_params(k1, num_heads, dim_model, dim_qk),
            "ln1": init_ln_params(dim_model),
            "attn2": init_mha_params(k2, num_heads, dim_model, dim_qk),
            "ln2": init_ln_params(dim_model),
            "ff": init_ffn_params(k3, dim_model, dim_ff),
            "ln3": init_ln_params(dim_model)}


# ---------------------------------------------------------------------------
# Pure-JAX reference (original per-head score formulation; correctness only)
# ---------------------------------------------------------------------------

def _ref_mha(q, k, v, p, num_heads):
    HQ = p["wq"].shape[1]
    dqk = HQ // num_heads
    wq = p["wq"].astype(jnp.float32)
    wk = p["wkv"][:, :HQ].astype(jnp.float32)
    wv = p["wkv"][:, HQ:].astype(jnp.float32)
    qp = q @ wq + p["bq"]
    kp = k @ wk + p["bkv"][:HQ]
    vp = v @ wv + p["bkv"][HQ:]
    heads = []
    for h in range(num_heads):
        sl = slice(h * dqk, (h + 1) * dqk)
        scores = jnp.einsum("btd,bsd->bts", qp[..., sl], kp[..., sl]) / math.sqrt(dqk)
        heads.append(jnp.einsum("bts,bsd->btd", scores, vp[..., sl]))
    return jnp.concatenate(heads, axis=-1) @ p["wo"].astype(jnp.float32) + p["bo"]


def _ref_ln(z, p, eps=1e-5):
    m = jnp.mean(z, -1, keepdims=True)
    v = jnp.mean((z - m) ** 2, -1, keepdims=True)
    return (z - m) / jnp.sqrt(v + eps) * p["gamma"] + p["beta"]


def _ref_decoder(tgt, memory, params, num_heads):
    tgt = _ref_ln(tgt + _ref_mha(tgt, tgt, tgt, params["attn1"], num_heads),
                  params["ln1"])
    tgt = _ref_ln(tgt + _ref_mha(tgt, memory, memory, params["attn2"], num_heads),
                  params["ln2"])
    pf = params["ff"]
    h = jnp.maximum(tgt @ pf["w1"].astype(jnp.float32) + pf["b1"], 0.0)
    ff = h @ pf["w2"].astype(jnp.float32) + pf["b2"]
    return _ref_ln(tgt + ff, params["ln3"])


# ---------------------------------------------------------------------------
if __name__ == "__main__":
    # dim_model=128 keeps every store lane-dense and gives dim_q = dim_k = 32.
    B, T_TGT, T_MEM = 2, 8, 8
    DIM_MODEL, NUM_HEADS, DIM_FF = 128, 4, 256

    key = jax.random.PRNGKey(0)
    k_tgt, k_mem, k_par = jax.random.split(key, 3)
    tgt = jax.random.normal(k_tgt, (B, T_TGT, DIM_MODEL), jnp.float32)
    memory = jax.random.normal(k_mem, (B, T_MEM, DIM_MODEL), jnp.float32)
    params = init_decoder_layer(k_par, DIM_MODEL, NUM_HEADS, DIM_FF)

    out = decoder_layer(tgt, memory, params, NUM_HEADS)
    out = jax.block_until_ready(out)

    with jax.default_matmul_precision("highest"):
        ref = _ref_decoder(tgt, memory, params, NUM_HEADS)
    ref = jax.block_until_ready(ref)

    assert out.shape == (B, T_TGT, DIM_MODEL)
    # bf16 weights + bf16 activations at the MXU input (the same bf16-quantized
    # weights are used by the f32 reference, so the remaining delta is the
    # activation rounding + MXU accumulation order) -> tolerance loosened vs a
    # pure-f32 check, as anticipated in the review.
    err = jnp.max(jnp.abs(out - ref))
    assert jnp.allclose(out, ref, atol=5e-2, rtol=5e-2), \
        f"mismatch vs JAX reference (max abs err {err})"

    print("KERNEL_OK")
</pallas_src>

<mosaic_0001>
module attributes {stable_mosaic.version = 11 : i64} {
  func.func @decoder_layer_kernel(%arg0: i32, %arg1: memref<2x8x128xf32, #tpu.memory_space<vmem>>, %arg2: memref<2x8x128xf32, #tpu.memory_space<vmem>>, %arg3: memref<128x128xf32, #tpu.memory_space<vmem>>, %arg4: memref<128x128xbf16, #tpu.memory_space<vmem>>, %arg5: memref<128x256xbf16, #tpu.memory_space<vmem>>, %arg6: memref<128x128xbf16, #tpu.memory_space<vmem>>, %arg7: memref<128x128xbf16, #tpu.memory_space<vmem>>, %arg8: memref<128x256xbf16, #tpu.memory_space<vmem>>, %arg9: memref<128x128xbf16, #tpu.memory_space<vmem>>, %arg10: memref<128x256xbf16, #tpu.memory_space<vmem>>, %arg11: memref<256x128xbf16, #tpu.memory_space<vmem>>, %arg12: memref<2x384xf32, #tpu.memory_space<vmem>>, %arg13: memref<1x256xf32, #tpu.memory_space<vmem>>, %arg14: memref<9x128xf32, #tpu.memory_space<vmem>>, %arg15: memref<2x8x128xf32, #tpu.memory_space<vmem>>) attributes {dimension_semantics = [#tpu.dimension_semantics<parallel>], iteration_bounds = array<i64: 1>, scalar_prefetch = 0 : i64, scratch_operands = 0 : i64, tpu.core_type = #tpu.core_type<tc>, window_params = [{transform_indices = @transform_0, window_bounds = array<i64: 2, 8, 128>}, {transform_indices = @transform_1, window_bounds = array<i64: 2, 8, 128>}, {pipeline_mode = #tpu.pipeline_mode<synchronous>, transform_indices = @transform_2, window_bounds = array<i64: 128, 128>}, {pipeline_mode = #tpu.pipeline_mode<synchronous>, transform_indices = @transform_3, window_bounds = array<i64: 128, 128>}, {pipeline_mode = #tpu.pipeline_mode<synchronous>, transform_indices = @transform_4, window_bounds = array<i64: 128, 256>}, {pipeline_mode = #tpu.pipeline_mode<synchronous>, transform_indices = @transform_5, window_bounds = array<i64: 128, 128>}, {pipeline_mode = #tpu.pipeline_mode<synchronous>, transform_indices = @transform_6, window_bounds = array<i64: 128, 128>}, {pipeline_mode = #tpu.pipeline_mode<synchronous>, transform_indices = @transform_7, window_bounds = array<i64: 128, 256>}, {pipeline_mode = #tpu.pipeline_mode<synchronous>, transform_indices = @transform_8, window_bounds = array<i64: 128, 128>}, {pipeline_mode = #tpu.pipeline_mode<synchronous>, transform_indices = @transform_9, window_bounds = array<i64: 128, 256>}, {pipeline_mode = #tpu.pipeline_mode<synchronous>, transform_indices = @transform_10, window_bounds = array<i64: 256, 128>}, {pipeline_mode = #tpu.pipeline_mode<synchronous>, transform_indices = @transform_11, window_bounds = array<i64: 2, 384>}, {pipeline_mode = #tpu.pipeline_mode<synchronous>, transform_indices = @transform_12, window_bounds = array<i64: 1, 256>}, {pipeline_mode = #tpu.pipeline_mode<synchronous>, transform_indices = @transform_13, window_bounds = array<i64: 9, 128>}, {transform_indices = @transform_14, window_bounds = array<i64: 2, 8, 128>}]} {
    %c0 = arith.constant 0 : index
    %c0_0 = arith.constant 0 : index
    %0 = vector.load %arg3[%c0, %c0_0] : memref<128x128xf32, #tpu.memory_space<vmem>>, vector<128x128xf32>
    %c0_1 = arith.constant 0 : index
    %c0_2 = arith.constant 0 : index
    %c0_3 = arith.constant 0 : index
    %1 = vector.load %arg1[%c0_1, %c0_2, %c0_3] : memref<2x8x128xf32, #tpu.memory_space<vmem>>, vector<2x8x128xf32>
    %2 = vector.shape_cast %1 : vector<2x8x128xf32> to vector<16x128xf32>
    %c0_4 = arith.constant 0 : index
    %c0_5 = arith.constant 0 : index
    %c0_6 = arith.constant 0 : index
    %3 = vector.load %arg2[%c0_4, %c0_5, %c0_6] : memref<2x8x128xf32, #tpu.memory_space<vmem>>, vector<2x8x128xf32>
    %4 = vector.shape_cast %3 : vector<2x8x128xf32> to vector<16x128xf32>
    %c0_7 = arith.constant 0 : index
    %c0_8 = arith.constant 0 : index
    %5 = vector.load %arg12[%c0_7, %c0_8] : memref<2x384xf32, #tpu.memory_space<vmem>>, vector<1x128xf32>
    %c0_9 = arith.constant 0 : index
    %c128 = arith.constant 128 : index
    %6 = vector.load %arg12[%c0_9, %c128] : memref<2x384xf32, #tpu.memory_space<vmem>>, vector<1x256xf32>
    %7 = arith.truncf %2 : vector<16x128xf32> to vector<16x128xbf16>
    %c0_10 = arith.constant 0 : index
    %c0_11 = arith.constant 0 : index
    %8 = vector.load %arg4[%c0_10, %c0_11] : memref<128x128xbf16, #tpu.memory_space<vmem>>, vector<128x128xbf16>
    %cst = arith.constant dense<0.000000e+00> : vector<16x128xf32>
    %9 = tpu.matmul %7, %8, %cst {dimension_numbers = #tpu.dot_dimension_numbers<[1], [0], [0], [1], [0, 0, 1, 1], [], []>} : vector<16x128xbf16>, vector<128x128xbf16>, vector<16x128xf32> -> vector<16x128xf32>
    %10 = vector.broadcast %5 : vector<1x128xf32> to vector<16x128xf32>
    %11 = arith.addf %9, %10 : vector<16x128xf32>
    %cst_12 = arith.constant 0.176776692 : f32
    %12 = vector.broadcast %cst_12 : f32 to vector<16x128xf32>
    %13 = arith.mulf %11, %12 : vector<16x128xf32>
    %14 = arith.truncf %2 : vector<16x128xf32> to vector<16x128xbf16>
    %c0_13 = arith.constant 0 : index
    %c0_14 = arith.constant 0 : index
    %15 = vector.load %arg5[%c0_13, %c0_14] : memref<128x256xbf16, #tpu.memory_space<vmem>>, vector<128x256xbf16>
    %cst_15 = arith.constant dense<0.000000e+00> : vector<16x256xf32>
    %16 = tpu.matmul %14, %15, %cst_15 {dimension_numbers = #tpu.dot_dimension_numbers<[1], [0], [0], [1], [0, 0, 1, 1], [], []>} : vector<16x128xbf16>, vector<128x256xbf16>, vector<16x256xf32> -> vector<16x256xf32>
    %17 = vector.broadcast %6 : vector<1x256xf32> to vector<16x256xf32>
    %18 = arith.addf %16, %17 : vector<16x256xf32>
    %19 = vector.extract_strided_slice %13 {offsets = [0, 0], sizes = [8, 128], strides = [1, 1]} : vector<16x128xf32> to vector<8x128xf32>
    %20 = vector.extract_strided_slice %18 {offsets = [0, 0], sizes = [8, 128], strides = [1, 1]} : vector<16x256xf32> to vector<8x128xf32>
    %21 = vector.extract_strided_slice %18 {offsets = [0, 128], sizes = [8, 128], strides = [1, 1]} : vector<16x256xf32> to vector<8x128xf32>
    %22 = tpu.transpose %20, [1, 0] : vector<8x128xf32> -> vector<128x8xf32>
    %cst_16 = arith.constant dense<0.000000e+00> : vector<128x128xf32>
    %23 = tpu.matmul %22, %21, %cst_16 {dimension_numbers = #tpu.dot_dimension_numbers<[1], [0], [0], [1], [0, 0, 1, 1], [], []>} : vector<128x8xf32>, vector<8x128xf32>, vector<128x128xf32> -> vector<128x128xf32>
    %24 = arith.mulf %23, %0 : vector<128x128xf32>
    %cst_17 = arith.constant dense<0.000000e+00> : vector<8x128xf32>
    %25 = tpu.matmul %19, %24, %cst_17 {dimension_numbers = #tpu.dot_dimension_numbers<[1], [0], [0], [1], [0, 0, 1, 1], [], []>} : vector<8x128xf32>, vector<128x128xf32>, vector<8x128xf32> -> vector<8x128xf32>
    %26 = vector.extract_strided_slice %13 {offsets = [8, 0], sizes = [8, 128], strides = [1, 1]} : vector<16x128xf32> to vector<8x128xf32>
    %27 = vector.extract_strided_slice %18 {offsets = [8, 0], sizes = [8, 128], strides = [1, 1]} : vector<16x256xf32> to vector<8x128xf32>
    %28 = vector.extract_strided_slice %18 {offsets = [8, 128], sizes = [8, 128], strides = [1, 1]} : vector<16x256xf32> to vector<8x128xf32>
    %29 = tpu.transpose %27, [1, 0] : vector<8x128xf32> -> vector<128x8xf32>
    %cst_18 = arith.constant dense<0.000000e+00> : vector<128x128xf32>
    %30 = tpu.matmul %29, %28, %cst_18 {dimension_numbers = #tpu.dot_dimension_numbers<[1], [0], [0], [1], [0, 0, 1, 1], [], []>} : vector<128x8xf32>, vector<8x128xf32>, vector<128x128xf32> -> vector<128x128xf32>
    %31 = arith.mulf %30, %0 : vector<128x128xf32>
    %cst_19 = arith.constant dense<0.000000e+00> : vector<8x128xf32>
    %32 = tpu.matmul %26, %31, %cst_19 {dimension_numbers = #tpu.dot_dimension_numbers<[1], [0], [0], [1], [0, 0, 1, 1], [], []>} : vector<8x128xf32>, vector<128x128xf32>, vector<8x128xf32> -> vector<8x128xf32>
    %33 = tpu.concatenate %25, %32 in 0 : vector<8x128xf32>, vector<8x128xf32> -> vector<16x128xf32>
    %34 = arith.truncf %33 : vector<16x128xf32> to vector<16x128xbf16>
    %c0_20 = arith.constant 0 : index
    %c0_21 = arith.constant 0 : index
    %35 = vector.load %arg6[%c0_20, %c0_21] : memref<128x128xbf16, #tpu.memory_space<vmem>>, vector<128x128xbf16>
    %cst_22 = arith.constant dense<0.000000e+00> : vector<16x128xf32>
    %36 = tpu.matmul %34, %35, %cst_22 {dimension_numbers = #tpu.dot_dimension_numbers<[1], [0], [0], [1], [0, 0, 1, 1], [], []>} : vector<16x128xbf16>, vector<128x128xbf16>, vector<16x128xf32> -> vector<16x128xf32>
    %c0_23 = arith.constant 0 : index
    %c0_24 = arith.constant 0 : index
    %37 = vector.load %arg14[%c0_23, %c0_24] : memref<9x128xf32, #tpu.memory_space<vmem>>, vector<1x128xf32>
    %38 = vector.broadcast %37 : vector<1x128xf32> to vector<16x128xf32>
    %39 = arith.addf %36, %38 : vector<16x128xf32>
    %40 = arith.addf %2, %39 : vector<16x128xf32>
    %cst_25 = arith.constant dense<0.000000e+00> : vector<16xf32>
    %41 = vector.multi_reduction <add>, %40, %cst_25 [1] : vector<16x128xf32> to vector<16xf32>
    %42 = vector.shape_cast %41 : vector<16xf32> to vector<16x1xf32>
    %cst_26 = arith.constant 1.280000e+02 : f32
    %43 = vector.broadcast %cst_26 : f32 to vector<16x1xf32>
    %44 = arith.divf %42, %43 : vector<16x1xf32>
    %45 = arith.mulf %40, %40 : vector<16x128xf32>
    %cst_27 = arith.constant dense<0.000000e+00> : vector<16xf32>
    %46 = vector.multi_reduction <add>, %45, %cst_27 [1] : vector<16x128xf32> to vector<16xf32>
    %47 = vector.shape_cast %46 : vector<16xf32> to vector<16x1xf32>
    %cst_28 = arith.constant 1.280000e+02 : f32
    %48 = vector.broadcast %cst_28 : f32 to vector<16x1xf32>
    %49 = arith.divf %47, %48 : vector<16x1xf32>
    %50 = arith.mulf %44, %44 : vector<16x1xf32>
    %51 = arith.subf %49, %50 : vector<16x1xf32>
    %cst_29 = arith.constant 9.99999974E-6 : f32
    %52 = vector.broadcast %cst_29 : f32 to vector<16x1xf32>
    %53 = arith.addf %51, %52 : vector<16x1xf32>
    %54 = math.rsqrt %53 : vector<16x1xf32>
    %c1 = arith.constant 1 : index
    %c0_30 = arith.constant 0 : index
    %55 = vector.load %arg14[%c1, %c0_30] : memref<9x128xf32, #tpu.memory_space<vmem>>, vector<1x128xf32>
    %56 = vector.broadcast %54 : vector<16x1xf32> to vector<16x128xf32>
    %57 = vector.broadcast %55 : vector<1x128xf32> to vector<16x128xf32>
    %58 = arith.mulf %56, %57 : vector<16x128xf32>
    %59 = arith.mulf %40, %58 : vector<16x128xf32>
    %c2 = arith.constant 2 : index
    %c0_31 = arith.constant 0 : index
    %60 = vector.load %arg14[%c2, %c0_31] : memref<9x128xf32, #tpu.memory_space<vmem>>, vector<1x128xf32>
    %61 = vector.broadcast %44 : vector<16x1xf32> to vector<16x128xf32>
    %62 = arith.mulf %61, %58 : vector<16x128xf32>
    %63 = vector.broadcast %60 : vector<1x128xf32> to vector<16x128xf32>
    %64 = arith.subf %63, %62 : vector<16x128xf32>
    %65 = arith.addf %59, %64 : vector<16x128xf32>
    %c1_32 = arith.constant 1 : index
    %c0_33 = arith.constant 0 : index
    %66 = vector.load %arg12[%c1_32, %c0_33] : memref<2x384xf32, #tpu.memory_space<vmem>>, vector<1x128xf32>
    %c1_34 = arith.constant 1 : index
    %c128_35 = arith.constant 128 : index
    %67 = vector.load %arg12[%c1_34, %c128_35] : memref<2x384xf32, #tpu.memory_space<vmem>>, vector<1x256xf32>
    %68 = arith.truncf %65 : vector<16x128xf32> to vector<16x128xbf16>
    %c0_36 = arith.constant 0 : index
    %c0_37 = arith.constant 0 : index
    %69 = vector.load %arg7[%c0_36, %c0_37] : memref<128x128xbf16, #tpu.memory_space<vmem>>, vector<128x128xbf16>
    %cst_38 = arith.constant dense<0.000000e+00> : vector<16x128xf32>
    %70 = tpu.matmul %68, %69, %cst_38 {dimension_numbers = #tpu.dot_dimension_numbers<[1], [0], [0], [1], [0, 0, 1, 1], [], []>} : vector<16x128xbf16>, vector<128x128xbf16>, vector<16x128xf32> -> vector<16x128xf32>
    %71 = vector.broadcast %66 : vector<1x128xf32> to vector<16x128xf32>
    %72 = arith.addf %70, %71 : vector<16x128xf32>
    %cst_39 = arith.constant 0.176776692 : f32
    %73 = vector.broadcast %cst_39 : f32 to vector<16x128xf32>
    %74 = arith.mulf %72, %73 : vector<16x128xf32>
    %75 = arith.truncf %4 : vector<16x128xf32> to vector<16x128xbf16>
    %c0_40 = arith.constant 0 : index
    %c0_41 = arith.constant 0 : index
    %76 = vector.load %arg8[%c0_40, %c0_41] : memref<128x256xbf16, #tpu.memory_space<vmem>>, vector<128x256xbf16>
    %cst_42 = arith.constant dense<0.000000e+00> : vector<16x256xf32>
    %77 = tpu.matmul %75, %76, %cst_42 {dimension_numbers = #tpu.dot_dimension_numbers<[1], [0], [0], [1], [0, 0, 1, 1], [], []>} : vector<16x128xbf16>, vector<128x256xbf16>, vector<16x256xf32> -> vector<16x256xf32>
    %78 = vector.broadcast %67 : vector<1x256xf32> to vector<16x256xf32>
    %79 = arith.addf %77, %78 : vector<16x256xf32>
    %80 = vector.extract_strided_slice %74 {offsets = [0, 0], sizes = [8, 128], strides = [1, 1]} : vector<16x128xf32> to vector<8x128xf32>
    %81 = vector.extract_strided_slice %79 {offsets = [0, 0], sizes = [8, 128], strides = [1, 1]} : vector<16x256xf32> to vector<8x128xf32>
    %82 = vector.extract_strided_slice %79 {offsets = [0, 128], sizes = [8, 128], strides = [1, 1]} : vector<16x256xf32> to vector<8x128xf32>
    %83 = tpu.transpose %81, [1, 0] : vector<8x128xf32> -> vector<128x8xf32>
    %cst_43 = arith.constant dense<0.000000e+00> : vector<128x128xf32>
    %84 = tpu.matmul %83, %82, %cst_43 {dimension_numbers = #tpu.dot_dimension_numbers<[1], [0], [0], [1], [0, 0, 1, 1], [], []>} : vector<128x8xf32>, vector<8x128xf32>, vector<128x128xf32> -> vector<128x128xf32>
    %85 = arith.mulf %84, %0 : vector<128x128xf32>
    %cst_44 = arith.constant dense<0.000000e+00> : vector<8x128xf32>
    %86 = tpu.matmul %80, %85, %cst_44 {dimension_numbers = #tpu.dot_dimension_numbers<[1], [0], [0], [1], [0, 0, 1, 1], [], []>} : vector<8x128xf32>, vector<128x128xf32>, vector<8x128xf32> -> vector<8x128xf32>
    %87 = vector.extract_strided_slice %74 {offsets = [8, 0], sizes = [8, 128], strides = [1, 1]} : vector<16x128xf32> to vector<8x128xf32>
    %88 = vector.extract_strided_slice %79 {offsets = [8, 0], sizes = [8, 128], strides = [1, 1]} : vector<16x256xf32> to vector<8x128xf32>
    %89 = vector.extract_strided_slice %79 {offsets = [8, 128], sizes = [8, 128], strides = [1, 1]} : vector<16x256xf32> to vector<8x128xf32>
    %90 = tpu.transpose %88, [1, 0] : vector<8x128xf32> -> vector<128x8xf32>
    %cst_45 = arith.constant dense<0.000000e+00> : vector<128x128xf32>
    %91 = tpu.matmul %90, %89, %cst_45 {dimension_numbers = #tpu.dot_dimension_numbers<[1], [0], [0], [1], [0, 0, 1, 1], [], []>} : vector<128x8xf32>, vector<8x128xf32>, vector<128x128xf32> -> vector<128x128xf32>
    %92 = arith.mulf %91, %0 : vector<128x128xf32>
    %cst_46 = arith.constant dense<0.000000e+00> : vector<8x128xf32>
    %93 = tpu.matmul %87, %92, %cst_46 {dimension_numbers = #tpu.dot_dimension_numbers<[1], [0], [0], [1], [0, 0, 1, 1], [], []>} : vector<8x128xf32>, vector<128x128xf32>, vector<8x128xf32> -> vector<8x128xf32>
    %94 = tpu.concatenate %86, %93 in 0 : vector<8x128xf32>, vector<8x128xf32> -> vector<16x128xf32>
    %95 = arith.truncf %94 : vector<16x128xf32> to vector<16x128xbf16>
    %c0_47 = arith.constant 0 : index
    %c0_48 = arith.constant 0 : index
    %96 = vector.load %arg9[%c0_47, %c0_48] : memref<128x128xbf16, #tpu.memory_space<vmem>>, vector<128x128xbf16>
    %cst_49 = arith.constant dense<0.000000e+00> : vector<16x128xf32>
    %97 = tpu.matmul %95, %96, %cst_49 {dimension_numbers = #tpu.dot_dimension_numbers<[1], [0], [0], [1], [0, 0, 1, 1], [], []>} : vector<16x128xbf16>, vector<128x128xbf16>, vector<16x128xf32> -> vector<16x128xf32>
    %c3 = arith.constant 3 : index
    %c0_50 = arith.constant 0 : index
    %98 = vector.load %arg14[%c3, %c0_50] : memref<9x128xf32, #tpu.memory_space<vmem>>, vector<1x128xf32>
    %99 = vector.broadcast %98 : vector<1x128xf32> to vector<16x128xf32>
    %100 = arith.addf %97, %99 : vector<16x128xf32>
    %101 = arith.addf %65, %100 : vector<16x128xf32>
    %cst_51 = arith.constant dense<0.000000e+00> : vector<16xf32>
    %102 = vector.multi_reduction <add>, %101, %cst_51 [1] : vector<16x128xf32> to vector<16xf32>
    %103 = vector.shape_cast %102 : vector<16xf32> to vector<16x1xf32>
    %cst_52 = arith.constant 1.280000e+02 : f32
    %104 = vector.broadcast %cst_52 : f32 to vector<16x1xf32>
    %105 = arith.divf %103, %104 : vector<16x1xf32>
    %106 = arith.mulf %101, %101 : vector<16x128xf32>
    %cst_53 = arith.constant dense<0.000000e+00> : vector<16xf32>
    %107 = vector.multi_reduction <add>, %106, %cst_53 [1] : vector<16x128xf32> to vector<16xf32>
    %108 = vector.shape_cast %107 : vector<16xf32> to vector<16x1xf32>
    %cst_54 = arith.constant 1.280000e+02 : f32
    %109 = vector.broadcast %cst_54 : f32 to vector<16x1xf32>
    %110 = arith.divf %108, %109 : vector<16x1xf32>
    %111 = arith.mulf %105, %105 : vector<16x1xf32>
    %112 = arith.subf %110, %111 : vector<16x1xf32>
    %cst_55 = arith.constant 9.99999974E-6 : f32
    %113 = vector.broadcast %cst_55 : f32 to vector<16x1xf32>
    %114 = arith.addf %112, %113 : vector<16x1xf32>
    %115 = math.rsqrt %114 : vector<16x1xf32>
    %c4 = arith.constant 4 : index
    %c0_56 = arith.constant 0 : index
    %116 = vector.load %arg14[%c4, %c0_56] : memref<9x128xf32, #tpu.memory_space<vmem>>, vector<1x128xf32>
    %117 = vector.broadcast %115 : vector<16x1xf32> to vector<16x128xf32>
    %118 = vector.broadcast %116 : vector<1x128xf32> to vector<16x128xf32>
    %119 = arith.mulf %117, %118 : vector<16x128xf32>
    %120 = arith.mulf %101, %119 : vector<16x128xf32>
    %c5 = arith.constant 5 : index
    %c0_57 = arith.constant 0 : index
    %121 = vector.load %arg14[%c5, %c0_57] : memref<9x128xf32, #tpu.memory_space<vmem>>, vector<1x128xf32>
    %122 = vector.broadcast %105 : vector<16x1xf32> to vector<16x128xf32>
    %123 = arith.mulf %122, %119 : vector<16x128xf32>
    %124 = vector.broadcast %121 : vector<1x128xf32> to vector<16x128xf32>
    %125 = arith.subf %124, %123 : vector<16x128xf32>
    %126 = arith.addf %120, %125 : vector<16x128xf32>
    %127 = arith.truncf %126 : vector<16x128xf32> to vector<16x128xbf16>
    %c0_58 = arith.constant 0 : index
    %c0_59 = arith.constant 0 : index
    %128 = vector.load %arg10[%c0_58, %c0_59] : memref<128x256xbf16, #tpu.memory_space<vmem>>, vector<128x256xbf16>
    %cst_60 = arith.constant dense<0.000000e+00> : vector<16x256xf32>
    %129 = tpu.matmul %127, %128, %cst_60 {dimension_numbers = #tpu.dot_dimension_numbers<[1], [0], [0], [1], [0, 0, 1, 1], [], []>} : vector<16x128xbf16>, vector<128x256xbf16>, vector<16x256xf32> -> vector<16x256xf32>
    %c0_61 = arith.constant 0 : index
    %c0_62 = arith.constant 0 : index
    %130 = vector.load %arg13[%c0_61, %c0_62] : memref<1x256xf32, #tpu.memory_space<vmem>>, vector<1x256xf32>
    %131 = vector.broadcast %130 : vector<1x256xf32> to vector<16x256xf32>
    %132 = arith.addf %129, %131 : vector<16x256xf32>
    %cst_63 = arith.constant 0.000000e+00 : f32
    %133 = vector.broadcast %cst_63 : f32 to vector<16x256xf32>
    %134 = arith.maximumf %132, %133 : vector<16x256xf32>
    %135 = arith.truncf %134 : vector<16x256xf32> to vector<16x256xbf16>
    %c0_64 = arith.constant 0 : index
    %c0_65 = arith.constant 0 : index
    %136 = vector.load %arg11[%c0_64, %c0_65] : memref<256x128xbf16, #tpu.memory_space<vmem>>, vector<256x128xbf16>
    %cst_66 = arith.constant dense<0.000000e+00> : vector<16x128xf32>
    %137 = tpu.matmul %135, %136, %cst_66 {dimension_numbers = #tpu.dot_dimension_numbers<[1], [0], [0], [1], [0, 0, 1, 1], [], []>} : vector<16x256xbf16>, vector<256x128xbf16>, vector<16x128xf32> -> vector<16x128xf32>
    %c6 = arith.constant 6 : index
    %c0_67 = arith.constant 0 : index
    %138 = vector.load %arg14[%c6, %c0_67] : memref<9x128xf32, #tpu.memory_space<vmem>>, vector<1x128xf32>
    %139 = vector.broadcast %138 : vector<1x128xf32> to vector<16x128xf32>
    %140 = arith.addf %137, %139 : vector<16x128xf32>
    %141 = arith.addf %126, %140 : vector<16x128xf32>
    %cst_68 = arith.constant dense<0.000000e+00> : vector<16xf32>
    %142 = vector.multi_reduction <add>, %141, %cst_68 [1] : vector<16x128xf32> to vector<16xf32>
    %143 = vector.shape_cast %142 : vector<16xf32> to vector<16x1xf32>
    %cst_69 = arith.constant 1.280000e+02 : f32
    %144 = vector.broadcast %cst_69 : f32 to vector<16x1xf32>
    %145 = arith.divf %143, %144 : vector<16x1xf32>
    %146 = arith.mulf %141, %141 : vector<16x128xf32>
    %cst_70 = arith.constant dense<0.000000e+00> : vector<16xf32>
    %147 = vector.multi_reduction <add>, %146, %cst_70 [1] : vector<16x128xf32> to vector<16xf32>
    %148 = vector.shape_cast %147 : vector<16xf32> to vector<16x1xf32>
    %cst_71 = arith.constant 1.280000e+02 : f32
    %149 = vector.broadcast %cst_71 : f32 to vector<16x1xf32>
    %150 = arith.divf %148, %149 : vector<16x1xf32>
    %151 = arith.mulf %145, %145 : vector<16x1xf32>
    %152 = arith.subf %150, %151 : vector<16x1xf32>
    %cst_72 = arith.constant 9.99999974E-6 : f32
    %153 = vector.broadcast %cst_72 : f32 to vector<16x1xf32>
    %154 = arith.addf %152, %153 : vector<16x1xf32>
    %155 = math.rsqrt %154 : vector<16x1xf32>
    %c7 = arith.constant 7 : index
    %c0_73 = arith.constant 0 : index
    %156 = vector.load %arg14[%c7, %c0_73] : memref<9x128xf32, #tpu.memory_space<vmem>>, vector<1x128xf32>
    %157 = vector.broadcast %155 : vector<16x1xf32> to vector<16x128xf32>
    %158 = vector.broadcast %156 : vector<1x128xf32> to vector<16x128xf32>
    %159 = arith.mulf %157, %158 : vector<16x128xf32>
    %160 = arith.mulf %141, %159 : vector<16x128xf32>
    %c8 = arith.constant 8 : index
    %c0_74 = arith.constant 0 : index
    %161 = vector.load %arg14[%c8, %c0_74] : memref<9x128xf32, #tpu.memory_space<vmem>>, vector<1x128xf32>
    %162 = vector.broadcast %145 : vector<16x1xf32> to vector<16x128xf32>
    %163 = arith.mulf %162, %159 : vector<16x128xf32>
    %164 = vector.broadcast %161 : vector<1x128xf32> to vector<16x128xf32>
    %165 = arith.subf %164, %163 : vector<16x128xf32>
    %166 = arith.addf %160, %165 : vector<16x128xf32>
    %167 = vector.shape_cast %166 : vector<16x128xf32> to vector<2x8x128xf32>
    %c0_75 = arith.constant 0 : index
    %c0_76 = arith.constant 0 : index
    %c0_77 = arith.constant 0 : index
    %168 = vector.load %arg15[%c0_75, %c0_76, %c0_77] : memref<2x8x128xf32, #tpu.memory_space<vmem>>, vector<2x8x128xf32>
    tpu.vector_store %arg15[%c0_75, %c0_76, %c0_77], %167 {strides = array<i32>} : memref<2x8x128xf32, #tpu.memory_space<vmem>>, vector<2x8x128xf32>,
    return
  }
  func.func @transform_0(%arg0: i32) -> (i32, i32, i32) {
    %c0_i32 = arith.constant 0 : i32
    %c0_i32_0 = arith.constant 0 : i32
    %c0_i32_1 = arith.constant 0 : i32
    return %arg0, %c0_i32, %c0_i32_0 : i32, i32, i32
  }
  func.func @transform_1(%arg0: i32) -> (i32, i32, i32) {
    %c0_i32 = arith.constant 0 : i32
    %c0_i32_0 = arith.constant 0 : i32
    %c0_i32_1 = arith.constant 0 : i32
    return %arg0, %c0_i32, %c0_i32_0 : i32, i32, i32
  }
  func.func @transform_2(%arg0: i32) -> (i32, i32) {
    %c0_i32 = arith.constant 0 : i32
    %c0_i32_0 = arith.constant 0 : i32
    %c0_i32_1 = arith.constant 0 : i32
    return %c0_i32, %c0_i32_0 : i32, i32
  }
  func.func @transform_3(%arg0: i32) -> (i32, i32) {
    %c0_i32 = arith.constant 0 : i32
    %c0_i32_0 = arith.constant 0 : i32
    %c0_i32_1 = arith.constant 0 : i32
    return %c0_i32, %c0_i32_0 : i32, i32
  }
  func.func @transform_4(%arg0: i32) -> (i32, i32) {
    %c0_i32 = arith.constant 0 : i32
    %c0_i32_0 = arith.constant 0 : i32
    %c0_i32_1 = arith.constant 0 : i32
    return %c0_i32, %c0_i32_0 : i32, i32
  }
  func.func @transform_5(%arg0: i32) -> (i32, i32) {
    %c0_i32 = arith.constant 0 : i32
    %c0_i32_0 = arith.constant 0 : i32
    %c0_i32_1 = arith.constant 0 : i32
    return %c0_i32, %c0_i32_0 : i32, i32
  }
  func.func @transform_6(%arg0: i32) -> (i32, i32) {
    %c0_i32 = arith.constant 0 : i32
    %c0_i32_0 = arith.constant 0 : i32
    %c0_i32_1 = arith.constant 0 : i32
    return %c0_i32, %c0_i32_0 : i32, i32
  }
  func.func @transform_7(%arg0: i32) -> (i32, i32) {
    %c0_i32 = arith.constant 0 : i32
    %c0_i32_0 = arith.constant 0 : i32
    %c0_i32_1 = arith.constant 0 : i32
    return %c0_i32, %c0_i32_0 : i32, i32
  }
  func.func @transform_8(%arg0: i32) -> (i32, i32) {
    %c0_i32 = arith.constant 0 : i32
    %c0_i32_0 = arith.constant 0 : i32
    %c0_i32_1 = arith.constant 0 : i32
    return %c0_i32, %c0_i32_0 : i32, i32
  }
  func.func @transform_9(%arg0: i32) -> (i32, i32) {
    %c0_i32 = arith.constant 0 : i32
    %c0_i32_0 = arith.constant 0 : i32
    %c0_i32_1 = arith.constant 0 : i32
    return %c0_i32, %c0_i32_0 : i32, i32
  }
  func.func @transform_10(%arg0: i32) -> (i32, i32) {
    %c0_i32 = arith.constant 0 : i32
    %c0_i32_0 = arith.constant 0 : i32
    %c0_i32_1 = arith.constant 0 : i32
    return %c0_i32, %c0_i32_0 : i32, i32
  }
  func.func @transform_11(%arg0: i32) -> (i32, i32) {
    %c0_i32 = arith.constant 0 : i32
    %c0_i32_0 = arith.constant 0 : i32
    %c0_i32_1 = arith.constant 0 : i32
    return %c0_i32, %c0_i32_0 : i32, i32
  }
  func.func @transform_12(%arg0: i32) -> (i32, i32) {
    %c0_i32 = arith.constant 0 : i32
    %c0_i32_0 = arith.constant 0 : i32
    %c0_i32_1 = arith.constant 0 : i32
    return %c0_i32, %c0_i32_0 : i32, i32
  }
  func.func @transform_13(%arg0: i32) -> (i32, i32) {
    %c0_i32 = arith.constant 0 : i32
    %c0_i32_0 = arith.constant 0 : i32
    %c0_i32_1 = arith.constant 0 : i32
    return %c0_i32, %c0_i32_0 : i32, i32
  }
  func.func @transform_14(%arg0: i32) -> (i32, i32, i32) {
    %c0_i32 = arith.constant 0 : i32
    %c0_i32_0 = arith.constant 0 : i32
    %c0_i32_1 = arith.constant 0 : i32
    return %arg0, %c0_i32, %c0_i32_0 : i32, i32, i32
  }
}

</mosaic_0001>

<bundles_post_ra>
// kernel: tpu_custom_call.1
= control target key start
LH: loop header
LB: loop body
LE: loop exit
PB: predicated region body
PF: predicated region fallthrough
CT: control target
= control target key end

     0   :  { %19 = vsyncpa [#allocation3], 0  ;;  %s4587_s0 = inlined_call_operand.hbm [shape: f32[2,8,128], index: 0, kind: input, shape index: {}]   ;;  %s4588_s1 = inlined_call_operand.hbm [shape: f32[2,8,128], index: 1, kind: input, shape index: {}]   ;;  %s4589_s2 = inlined_call_operand.hbm [shape: f32[128,128], index: 2, kind: input, shape index: {}]   ;;  %s4590_s3 = inlined_call_operand.hbm [shape: bf16[128,128], index: 3, kind: input, shape index: {}]   ;;  %s4591_s4 = inlined_call_operand.hbm [shape: bf16[128,256], index: 4, kind: input, shape index: {}]   ;;  %s4592_s5 = inlined_call_operand.hbm [shape: bf16[128,128], index: 5, kind: input, shape index: {}]   ;;  %s4593_s6 = inlined_call_operand.hbm [shape: bf16[128,128], index: 6, kind: input, shape index: {}]   ;;  %s4594_s7 = inlined_call_operand.hbm [shape: bf16[128,256], index: 7, kind: input, shape index: {}]   ;;  %s4595_s8 = inlined_call_operand.hbm [shape: bf16[128,128], index: 8, kind: input, shape index: {}]   ;;  %s4596_s9 = inlined_call_operand.hbm [shape: bf16[128,256], index: 9, kind: input, shape index: {}]   ;;  %s4597_s10 = inlined_call_operand.hbm [shape: bf16[256,128], index: 10, kind: input, shape index: {}]   ;;  %s4598_s11 = inlined_call_operand.vmem [shape: f32[2,384], index: 11, kind: input, shape index: {}]   ;;  %s4599_s12 = inlined_call_operand.vmem [shape: f32[1,256], index: 12, kind: input, shape index: {}]   ;;  %s4600_s13 = inlined_call_operand.vmem [shape: f32[9,128], index: 13, kind: input, shape index: {}]   ;;  %s4601_s14 = inlined_call_operand.hbm [shape: f32[2,8,128], index: 14, kind: output, shape index: {}]  }
   0x1   :  { %20 = vsyncpa [#allocation6], 0 }
   0x2   :  { %21 = vsyncpa [#allocation9], 0 }
   0x3   :  { %22 = vsyncpa [#allocation12], 0 }
   0x4   :  { %23 = vsyncpa [#allocation15], 0 }
   0x5   :  { %24 = vsyncpa [#allocation18], 0 }
   0x6   :  { %25 = vsyncpa [#allocation4], 0  ;;  %s3922_s29 = smov [#allocation5]   ;;  %s3923_s15 = smov [#allocation8]  }
   0x7   :  { %s43_s30 = sshll.u32 %s3922_s29, 4  ;;  %s67_s16 = sshll.u32 %s3923_s15, 4  ;;  %s44_s30 = int_to_ptr.vmem [resolvable:$true] %s43_s30  ;;  %s4017_s16 = int_to_ptr.vmem [resolvable:$true] %s67_s16 }
   0x8   :  { %s3644_s19 = scalar_lea.hbm %s4588_s1, 256 }
   0x9   :  { %p3645_p0 = scmp.ne.s32.totalorder %s4588_s1, %s3644_s19  ;;  %p3648_p1 = scmp.lt.u32.totalorder %s3644_s19, %s4588_s1 }
   0xb   :  { %p3650_p2 = pnand %p3648_p1, %p3645_p0 }
   0xd   :  { %3653 = shalt.err (!%p3650_p2)
}
   0xe   :  { %s3654_s24 = scalar_lea.vmem %s44_s30, 256  ;;  %p3659_p4 = scmp.lt.s32.totalorder %s44_s30, %s44_s30 }
   0xf   :  { %p3655_p3 = scmp.ne.s32.totalorder %s44_s30, %s3654_s24  ;;  %p3660_p5 = scmp.lt.s32.totalorder %s3654_s24, %s3654_s24 }
  0x11   :  { %p3661_p6 = por %p3660_p5, %p3659_p4 }
  0x13   :  { %p3662_p7 = pnand %p3661_p6, %p3655_p3 }
  0x15   :  { %3665 = shalt.err (!%p3662_p7)
}
  0x16   :  { %s4602_s25 = smov 128   ;;  %s3925_s26 = smov 8  }
  0x17   :  { %49 = dma.hbm_to_vmem [thread:$0]  %s4588_s1, 256, %s44_s30, [#allocation6], %s4602_s25, %s4602_s25, %s3925_s26  }
  0x18   :  { %s3666_s17 = scalar_lea.hbm %s4590_s3, 1024 }
  0x19   :  { %p3667_p8 = scmp.ne.s32.totalorder %s4590_s3, %s3666_s17  ;;  %p3670_p9 = scmp.lt.u32.totalorder %s3666_s17, %s4590_s3 }
  0x1b   :  { %p3672_p10 = pnand %p3670_p9, %p3667_p8 }
  0x1d   :  { %3675 = shalt.err (!%p3672_p10)
}
  0x1e   :  { %s3676_s22 = scalar_lea.vmem %s4017_s16, 1024  ;;  %p3681_p12 = scmp.lt.s32.totalorder %s4017_s16, %s4017_s16 }
  0x1f   :  { %p3677_p11 = scmp.ne.s32.totalorder %s4017_s16, %s3676_s22  ;;  %p3682_p13 = scmp.lt.s32.totalorder %s3676_s22, %s3676_s22 }
  0x21   :  { %p3683_p0 = por %p3682_p13, %p3681_p12 }
  0x23   :  { %p3684_p1 = pnand %p3683_p0, %p3677_p11 }
  0x25   :  { %3687 = shalt.err (!%p3684_p1)
}
  0x26   :  { %s3926_s1 = smov 64   ;;  %s3927_s30 = smov 4  }
  0x27   :  { %73 = dma.hbm_to_vmem [thread:$0]  %s4590_s3, 1024, %s4017_s16, [#allocation9], %s3926_s1, %s3926_s1, %s3927_s30  }
  0x28   :  { %s3928_s27 = smov [#allocation11]   ;;  %s3929_s29 = smov [#allocation14]  }
  0x29   :  { %s91_s28 = sshll.u32 %s3928_s27, 4  ;;  %s115_s15 = sshll.u32 %s3929_s29, 4  ;;  %s92_s28 = int_to_ptr.vmem [resolvable:$true] %s91_s28  ;;  %s4054_s15 = int_to_ptr.vmem [resolvable:$true] %s115_s15 }
  0x2a   :  { %s3688_s19 = scalar_lea.hbm %s4592_s5, 1024 }
  0x2b   :  { %p3689_p2 = scmp.ne.s32.totalorder %s4592_s5, %s3688_s19  ;;  %p3692_p3 = scmp.lt.u32.totalorder %s3688_s19, %s4592_s5 }
  0x2d   :  { %p3694_p4 = pnand %p3692_p3, %p3689_p2 }
  0x2f   :  { %3697 = shalt.err (!%p3694_p4)
}
  0x30   :  { %s3698_s3 = scalar_lea.vmem %s92_s28, 1024  ;;  %p3703_p6 = scmp.lt.s32.totalorder %s92_s28, %s92_s28 }
  0x31   :  { %p3699_p5 = scmp.ne.s32.totalorder %s92_s28, %s3698_s3  ;;  %p3704_p7 = scmp.lt.s32.totalorder %s3698_s3, %s3698_s3 }
  0x33   :  { %p3705_p8 = por %p3704_p7, %p3703_p6 }
  0x35   :  { %p3706_p9 = pnand %p3705_p8, %p3699_p5 }
  0x37   :  { %3709 = shalt.err (!%p3706_p9)
}
  0x38   :  { %97 = dma.hbm_to_vmem [thread:$0]  %s4592_s5, 1024, %s92_s28, [#allocation12], %s3926_s1, %s3926_s1, %s3927_s30  }
  0x39   :  { %s3710_s25 = scalar_lea.hbm %s4594_s7, 2048 }
  0x3a   :  { %p3711_p10 = scmp.ne.s32.totalorder %s4594_s7, %s3710_s25  ;;  %p3714_p11 = scmp.lt.u32.totalorder %s3710_s25, %s4594_s7 }
  0x3c   :  { %p3716_p12 = pnand %p3714_p11, %p3711_p10 }
  0x3e   :  { %3719 = shalt.err (!%p3716_p12)
}
  0x3f   :  { %s3720_s20 = scalar_lea.vmem %s4054_s15, 2048  ;;  %p3725_p0 = scmp.lt.s32.totalorder %s4054_s15, %s4054_s15 }
  0x40   :  { %p3721_p13 = scmp.ne.s32.totalorder %s4054_s15, %s3720_s20  ;;  %p3726_p1 = scmp.lt.s32.totalorder %s3720_s20, %s3720_s20 }
  0x42   :  { %p3727_p2 = por %p3726_p1, %p3725_p0 }
  0x44   :  { %p3728_p3 = pnand %p3727_p2, %p3721_p13 }
  0x46   :  { %3731 = shalt.err (!%p3728_p3)
}
  0x47   :  { %s4604_s5 = smov 128   ;;  %s3930_s22 = smov [#allocation17]  }
  0x48   :  { %121 = dma.hbm_to_vmem [thread:$0]  %s4594_s7, 2048, %s4054_s15, [#allocation15], %s4604_s5, %s4604_s5, %s3925_s26  }
  0x49   :  { %s139_s3 = sshll.u32 %s3930_s22, 4  ;;  %s3931_s16 = smov [#allocation2]   ;;  %s140_s3 = int_to_ptr.vmem [resolvable:$true] %s139_s3 }
  0x4a   :  { %s31_s23 = sshll.u32 %s3931_s16, 4  ;;  %s3732_s25 = scalar_lea.hbm %s4596_s9, 2048  ;;  %s4091_s23 = int_to_ptr.vmem [resolvable:$true] %s31_s23 }
  0x4b   :  { %p3733_p4 = scmp.ne.s32.totalorder %s4596_s9, %s3732_s25  ;;  %p3736_p5 = scmp.lt.u32.totalorder %s3732_s25, %s4596_s9 }
  0x4d   :  { %p3738_p6 = pnand %p3736_p5, %p3733_p4 }
  0x4f   :  { %3741 = shalt.err (!%p3738_p6)
}
  0x50   :  { %s3742_s7 = scalar_lea.vmem %s140_s3, 2048  ;;  %p3747_p8 = scmp.lt.s32.totalorder %s140_s3, %s140_s3 }
  0x51   :  { %p3743_p7 = scmp.ne.s32.totalorder %s140_s3, %s3742_s7  ;;  %p3748_p9 = scmp.lt.s32.totalorder %s3742_s7, %s3742_s7 }
  0x53   :  { %p3749_p10 = por %p3748_p9, %p3747_p8 }
  0x55   :  { %p3750_p11 = pnand %p3749_p10, %p3743_p7 }
  0x57   :  { %3753 = shalt.err (!%p3750_p11)
}
  0x58   :  { %145 = dma.hbm_to_vmem [thread:$0]  %s4596_s9, 2048, %s140_s3, [#allocation18], %s4604_s5, %s4604_s5, %s3925_s26  }
  0x59   :  { %s3754_s22 = scalar_lea.hbm %s4587_s0, 256 }
  0x5a   :  { %p3755_p12 = scmp.ne.s32.totalorder %s4587_s0, %s3754_s22  ;;  %p3758_p13 = scmp.lt.u32.totalorder %s3754_s22, %s4587_s0 }
  0x5c   :  { %p3760_p0 = pnand %p3758_p13, %p3755_p12 }
  0x5e   :  { %3763 = shalt.err (!%p3760_p0)
}
  0x5f   :  { %s3764_s29 = scalar_lea.vmem %s4091_s23, 256  ;;  %p3769_p2 = scmp.lt.s32.totalorder %s4091_s23, %s4091_s23 }
  0x60   :  { %p3765_p1 = scmp.ne.s32.totalorder %s4091_s23, %s3764_s29  ;;  %p3770_p3 = scmp.lt.s32.totalorder %s3764_s29, %s3764_s29 }
  0x62   :  { %p3771_p4 = por %p3770_p3, %p3769_p2 }
  0x64   :  { %p3772_p5 = pnand %p3771_p4, %p3765_p1 }
  0x66   :  { %3775 = shalt.err (!%p3772_p5)
}
  0x67   :  { %37 = dma.hbm_to_vmem [thread:$0]  %s4587_s0, 256, %s4091_s23, [#allocation3], %s4604_s5, %s4604_s5, %s3925_s26  }
  0x68   :  { %s3932_s17 = smov [#allocation7]   ;;  %s3933_s19 = smov [#allocation10]  }
  0x69   :  { %s55_s18 = sshll.u32 %s3932_s17, 4  ;;  %s79_s7 = sshll.u32 %s3933_s19, 4  ;;  %s56_s18 = int_to_ptr.vmem [resolvable:$true] %s55_s18  ;;  %s4128_s7 = int_to_ptr.vmem [resolvable:$true] %s79_s7 }
  0x6a   :  { %s3776_s28 = scalar_lea.hbm %s4589_s2, 2048 }
  0x6b   :  { %p3777_p6 = scmp.ne.s32.totalorder %s4589_s2, %s3776_s28  ;;  %p3780_p7 = scmp.lt.u32.totalorder %s3776_s28, %s4589_s2 }
  0x6d   :  { %p3782_p8 = pnand %p3780_p7, %p3777_p6 }
  0x6f   :  { %3785 = shalt.err (!%p3782_p8)
}
  0x70   :  { %s3786_s0 = scalar_lea.vmem %s56_s18, 2048  ;;  %p3791_p10 = scmp.lt.s32.totalorder %s56_s18, %s56_s18 }
  0x71   :  { %p3787_p9 = scmp.ne.s32.totalorder %s56_s18, %s3786_s0  ;;  %p3792_p11 = scmp.lt.s32.totalorder %s3786_s0, %s3786_s0 }
  0x73   :  { %p3793_p12 = por %p3792_p11, %p3791_p10 }
  0x75   :  { %p3794_p13 = pnand %p3793_p12, %p3787_p9 }
  0x77   :  { %3797 = shalt.err (!%p3794_p13)
}
  0x78   :  { %61 = dma.hbm_to_vmem [thread:$0]  %s4589_s2, 2048, %s56_s18, [#allocation6], %s4604_s5, %s4604_s5, %s3925_s26  }
  0x79   :  { %s3798_s9 = scalar_lea.hbm %s4591_s4, 2048 }
  0x7a   :  { %p3799_p0 = scmp.ne.s32.totalorder %s4591_s4, %s3798_s9  ;;  %p3802_p1 = scmp.lt.u32.totalorder %s3798_s9, %s4591_s4 }
  0x7c   :  { %p3804_p2 = pnand %p3802_p1, %p3799_p0 }
  0x7e   :  { %3807 = shalt.err (!%p3804_p2)
}
  0x7f   :  { %s3808_s20 = scalar_lea.vmem %s4128_s7, 2048  ;;  %p3813_p4 = scmp.lt.s32.totalorder %s4128_s7, %s4128_s7 }
  0x80   :  { %p3809_p3 = scmp.ne.s32.totalorder %s4128_s7, %s3808_s20  ;;  %p3814_p5 = scmp.lt.s32.totalorder %s3808_s20, %s3808_s20 }
  0x82   :  { %p3815_p6 = por %p3814_p5, %p3813_p4 }
  0x84   :  { %p3816_p7 = pnand %p3815_p6, %p3809_p3 }
  0x86   :  { %3819 = shalt.err (!%p3816_p7)
}
  0x87   :  { %85 = dma.hbm_to_vmem [thread:$0]  %s4591_s4, 2048, %s4128_s7, [#allocation9], %s4604_s5, %s4604_s5, %s3925_s26  }
  0x88   :  { %s3934_s28 = smov [#allocation13]   ;;  %s3935_s22 = smov [#allocation16]  }
  0x89   :  { %s103_s21 = sshll.u32 %s3934_s28, 4  ;;  %s127_s16 = sshll.u32 %s3935_s22, 4  ;;  %s104_s21 = int_to_ptr.vmem [resolvable:$true] %s103_s21  ;;  %s4165_s16 = int_to_ptr.vmem [resolvable:$true] %s127_s16 }
  0x8a   :  { %s3820_s23 = scalar_lea.hbm %s4593_s6, 1024 }
  0x8b   :  { %p3821_p8 = scmp.ne.s32.totalorder %s4593_s6, %s3820_s23  ;;  %p3824_p9 = scmp.lt.u32.totalorder %s3820_s23, %s4593_s6 }
  0x8d   :  { %p3826_p10 = pnand %p3824_p9, %p3821_p8 }
  0x8f   :  { %3829 = shalt.err (!%p3826_p10)
}
  0x90   :  { %s3830_s4 = scalar_lea.vmem %s104_s21, 1024  ;;  %p3835_p12 = scmp.lt.s32.totalorder %s104_s21, %s104_s21 }
  0x91   :  { %p3831_p11 = scmp.ne.s32.totalorder %s104_s21, %s3830_s4  ;;  %p3836_p13 = scmp.lt.s32.totalorder %s3830_s4, %s3830_s4 }
  0x93   :  { %p3837_p0 = por %p3836_p13, %p3835_p12 }
  0x95   :  { %p3838_p1 = pnand %p3837_p0, %p3831_p11 }
  0x97   :  { %3841 = shalt.err (!%p3838_p1)
}
  0x98   :  { %109 = dma.hbm_to_vmem [thread:$0]  %s4593_s6, 1024, %s104_s21, [#allocation12], %s3926_s1, %s3926_s1, %s3927_s30  }
  0x99   :  { %s3842_s15 = scalar_lea.hbm %s4595_s8, 1024 }
  0x9a   :  { %p3843_p2 = scmp.ne.s32.totalorder %s4595_s8, %s3842_s15  ;;  %p3846_p3 = scmp.lt.u32.totalorder %s3842_s15, %s4595_s8 }
  0x9c   :  { %p3848_p4 = pnand %p3846_p3, %p3843_p2 }
  0x9e   :  { %3851 = shalt.err (!%p3848_p4)
}
  0x9f   :  { %s3852_s22 = scalar_lea.vmem %s4165_s16, 1024  ;;  %p3857_p6 = scmp.lt.s32.totalorder %s4165_s16, %s4165_s16 }
  0xa0   :  { %p3853_p5 = scmp.ne.s32.totalorder %s4165_s16, %s3852_s22  ;;  %p3858_p7 = scmp.lt.s32.totalorder %s3852_s22, %s3852_s22 }
  0xa2   :  { %p3859_p8 = por %p3858_p7, %p3857_p6 }
  0xa4   :  { %p3860_p9 = pnand %p3859_p8, %p3853_p5 }
  0xa6   :  { %3863 = shalt.err (!%p3860_p9)
}
  0xa7   :  { %133 = dma.hbm_to_vmem [thread:$0]  %s4595_s8, 1024, %s4165_s16, [#allocation15], %s3926_s1, %s3926_s1, %s3927_s30  }
  0xa8   :  { %s3936_s24 = smov [#allocation19]   ;;  %s3864_s25 = scalar_lea.hbm %s4597_s10, 2048 }
  0xa9   :  { %s151_s0 = sshll.u32 %s3936_s24, 4  ;;  %p3865_p10 = scmp.ne.s32.totalorder %s4597_s10, %s3864_s25  ;;  %s152_s0 = int_to_ptr.vmem [resolvable:$true] %s151_s0 }
  0xaa   :  { %p3868_p11 = scmp.lt.u32.totalorder %s3864_s25, %s4597_s10 }
  0xac   :  { %p3870_p12 = pnand %p3868_p11, %p3865_p10 }
  0xae   :  { %3873 = shalt.err (!%p3870_p12)
}
  0xaf   :  { %s3874_s3 = scalar_lea.vmem %s152_s0, 2048  ;;  %p3879_p0 = scmp.lt.s32.totalorder %s152_s0, %s152_s0 }
  0xb0   :  { %p3875_p13 = scmp.ne.s32.totalorder %s152_s0, %s3874_s3  ;;  %p3880_p1 = scmp.lt.s32.totalorder %s3874_s3, %s3874_s3 }
  0xb2   :  { %p3881_p2 = por %p3880_p1, %p3879_p0 }
  0xb4   :  { %p3882_p3 = pnand %p3881_p2, %p3875_p13 }
  0xb6   :  { %3885 = shalt.err (!%p3882_p3)
}
  0xb7   :  { %157 = dma.hbm_to_vmem [thread:$0]  %s4597_s10, 2048, %s152_s0, [#allocation18], %s3926_s1, %s3926_s1, %s3927_s30  }
  0xb8   :  { %3908 = dma.done.wait [#allocation3], 256  }
  0xb9   :  { %3909 = vsyncadd [#allocation3], 4294967040 }
  0xba   :  { %3910 = dma.done.wait [#allocation6], 2304  }
  0xbb   :  { %3911 = vsyncadd [#allocation6], 4294964992 }
  0xbc   :  { %3912 = dma.done.wait [#allocation9], 3072  }
  0xbd   :  { %3913 = vsyncadd [#allocation9], 4294964224 }
  0xbe   :  { %3914 = dma.done.wait [#allocation12], 2048  }
  0xbf   :  { %3915 = vsyncadd [#allocation12], 4294965248 }
  0xc0   :  { %3916 = dma.done.wait [#allocation15], 3072  }
  0xc1   :  { %3917 = vsyncadd [#allocation15], 4294964224 }
  0xc2   :  { %3918 = dma.done.wait [#allocation18], 4096  }
  0xc3   :  { %3919 = vsyncadd [#allocation18], 4294963200  ;;  %v3937_v0 = vmov 0   ;;  %v3938_v1 = vmov 0.0   ;;  %v3512_v2 = vld [vmem:[#allocation10 + $0x4] ss:$8 sps:$4 sm:$0xff]   ;;  %v350_v29 = vlaneseq }
  0xc4   :  { %472 = vmatprep.mubr.bf16.mxu1 %v3937_v0  ;;  %3072 = vmatprep.subr.bf16.mxu0 %v3938_v1  ;;  %v3514_v3 = vld [vmem:[#allocation10] ss:$8 sps:$4 sm:$0xff]   ;;  %v3515_v4 = vld [vmem:[#allocation10 + $0x14] ss:$8 sps:$4 sm:$0xff]   ;;  %v3517_v5 = vld [vmem:[#allocation10 + $0x10] ss:$8 sps:$4 sm:$0xff]  }
  0xc5   :  { %440 = vmatprep.subr.bf16.mxu1 %v3512_v2  ;;  %v3518_v6 = vld [vmem:[#allocation10 + $0x24] ss:$8 sps:$4 sm:$0xff]   ;;  %v3520_v7 = vld [vmem:[#allocation10 + $0x20] ss:$8 sps:$4 sm:$0xff]   ;;  %v3521_v8 = vld [vmem:[#allocation10 + $0x34] ss:$8 sps:$4 sm:$0xff]  }
  0xc6   :  { %441 = vmatpush1.bf16.msra.mxu1 %v3514_v3  ;;  %v3523_v9 = vld [vmem:[#allocation10 + $0x30] ss:$8 sps:$4 sm:$0xff]   ;;  %v3524_v10 = vld [vmem:[#allocation10 + $0x44] ss:$8 sps:$4 sm:$0xff]   ;;  %v3526_v13 = vld [vmem:[#allocation10 + $0x40] ss:$8 sps:$4 sm:$0xff]  }
  0xc7   :  { %442 = vmatprep.subr.bf16.mxu1 %v3515_v4  ;;  %v3536_v11 = vld [vmem:[#allocation8] sm:$0xff]   ;;  %v3537_v12 = vld [vmem:[#allocation8 + $0x8] sm:$0xff]   ;;  %v3527_v14 = vld [vmem:[#allocation10 + $0x54] ss:$8 sps:$4 sm:$0xff]   ;;  %vm3939_vm0 = vmmov 0   ;;  %v351_v30 = vshrl.u32 %v350_v29, 7 }
  0xc8   :  { %3073 = vmatpush3.bf16.msra.mxu0 %v3536_v11  ;;  %v3529_v15 = vld [vmem:[#allocation10 + $0x50] ss:$8 sps:$4 sm:$0xff]   ;;  %v3530_v16 = vld [vmem:[#allocation10 + $0x64] ss:$8 sps:$4 sm:$0xff]   ;;  %v3532_v19 = vld [vmem:[#allocation10 + $0x60] ss:$8 sps:$4 sm:$0xff]   ;;  %3088 = vmatprep.mubr.msk.bf16.mxu0 %vm3939_vm0, %v3938_v1 }
  0xc9   :  { %3074 = vmatprep.subr.bf16.mxu0 %v3938_v1  ;;  %v3538_v17 = vld [vmem:[#allocation8 + $0x10] sm:$0xff]   ;;  %v3539_v18 = vld [vmem:[#allocation8 + $0x18] sm:$0xff]   ;;  %v3540_v21 = vld [vmem:[#allocation8 + $0x20] sm:$0xff]   ;;  %v4236_v31 = vsub.s32 0, %v351_v30  ;;  %v4241_v33 = vsub.s32 1, %v351_v30  ;;  %vm515_vm1 = vcmask 64512  }
  0xca   :  { %443 = vmatpush1.bf16.msra.mxu1 %v3517_v5  ;;  %v3533_v20 = vld [vmem:[#allocation10 + $0x74] ss:$8 sps:$4 sm:$0xff]   ;;  %v3535_v22 = vld [vmem:[#allocation10 + $0x70] ss:$8 sps:$4 sm:$0xff]   ;;  %v4222_v23 = vld [vmem:[#allocation2] sm:$0xff]  ;;  %v3940_v4 = vmov 0.0|0.0  }
  0xcb   :  { %444 = vmatprep.subr.bf16.mxu1 %v3518_v6  ;;  %v4224_v24 = vld [vmem:[#allocation2 + $0x8] sm:$0xff]  ;;  %v3542_v27 = vld [vmem:[#allocation8 + $0x30] sm:$0xff]   ;;  %v3543_v28 = vld [vmem:[#allocation8 + $0x38] sm:$0xff]   ;;  %s3941_s1 = smov [#allocation20]  }
  0xcc   :  { %3075 = vmatpush3.bf16.msra.mxu0 %v3537_v12  ;;  %v3541_v25 = vld [vmem:[#allocation8 + $0x28] sm:$0xff]   ;;  %v221_v26 = vpack.c.bf16 %v4224_v24, %v4222_v23  ;;  %v2705_v32 = vld [vmem:[%s4598_s11 + $0x2] ss:$2 sm:$0x3]  ;;  %v4250_v44 = vld [vmem:[%s4598_s11] ss:$0 sm:$0xff] }
  0xcd   :  { %3076 = vmatprep.subr.bf16.mxu0 %v3938_v1  ;;  %v353_v34 = vrot.slane %v2705_v32, %v4236_v31  ;;  %v357_v35 = vrot.slane %v2705_v32, %v4241_v33  ;;  %v4277_v5 = vld [vmem:[#allocation7 + $0x8] sm:$0xff]  ;;  %v4279_v6 = vld [vmem:[#allocation7] sm:$0xff]  ;;  %v4303_v32 = vld [vmem:[#allocation7 + $0x38] sm:$0xff]  ;;  %s2688_s30 = sshll.u32 %s3941_s1, 4  ;;  %s2689_s30 = int_to_ptr.vmem [resolvable:$true] %s2688_s30 }
  0xce   :  { %445 = vmatpush1.bf16.msra.mxu1 %v3520_v7  ;;  %s3886_s17 = scalar_lea.vmem %s2689_s30, 256  ;;  %p3891_p5 = scmp.lt.s32.totalorder %s2689_s30, %s2689_s30 }
  0xcf   :  { %446 = vmatprep.subr.bf16.mxu1 %v3521_v8  ;;  %p3887_p4 = scmp.ne.s32.totalorder %s2689_s30, %s3886_s17  ;;  %p3892_p6 = scmp.lt.s32.totalorder %s3886_s17, %s3886_s17 }
  0xd0   :  { %3077 = vmatpush3.bf16.msra.mxu0 %v3538_v17 }
  0xd1   :  { %3078 = vmatprep.subr.bf16.mxu0 %v3938_v1  ;;  %p3893_p7 = por %p3892_p6, %p3891_p5 }
  0xd2   :  { %447 = vmatpush1.bf16.msra.mxu1 %v3523_v9 }
  0xd3   :  { %448 = vmatprep.subr.bf16.mxu1 %v3524_v10  ;;  %p3894_p8 = pnand %p3893_p7, %p3887_p4 }
  0xd4   :  { %3079 = vmatpush3.bf16.msra.mxu0 %v3539_v18 }
  0xd5   :  { %3080 = vmatprep.subr.bf16.mxu0 %v3938_v1 }
  0xd6   :  { %449 = vmatpush1.bf16.msra.mxu1 %v3526_v13  ;;  %v4285_v13 = vld [vmem:[#allocation7 + $0x18] sm:$0xff] }
  0xd7   :  { %450 = vmatprep.subr.bf16.mxu1 %v3527_v14  ;;  %v4287_v14 = vld [vmem:[#allocation7 + $0x10] sm:$0xff] }
  0xd8   :  { %3081 = vmatpush3.bf16.msra.mxu0 %v3540_v21  ;;  %v4294_v21 = vld [vmem:[#allocation7 + $0x28] sm:$0xff] }
  0xd9   :  { %3082 = vmatprep.subr.bf16.mxu0 %v3938_v1 }
  0xda   :  { %451 = vmatpush1.bf16.msra.mxu1 %v3529_v15 }
  0xdb   :  { %452 = vmatprep.subr.bf16.mxu1 %v3530_v16 }
  0xdc   :  { %3083 = vmatpush3.bf16.msra.mxu0 %v3541_v25 }
  0xdd   :  { %3084 = vmatprep.subr.bf16.mxu0 %v3938_v1 }
  0xde   :  { %453 = vmatpush1.bf16.msra.mxu1 %v3532_v19 }
  0xdf   :  { %454 = vmatprep.subr.bf16.mxu1 %v3533_v20 }
  0xe0   :  { %3085 = vmatpush3.bf16.msra.mxu0 %v3542_v27 }
  0xe1   :  { %3086 = vmatprep.subr.bf16.mxu0 %v3938_v1 }
  0xe2   :  { %455 = vmatpush1.bf16.msra.mxu1 %v3535_v22  ;;  %v4296_v22 = vld [vmem:[#allocation7 + $0x20] sm:$0xff] }
  0xe3   :  { %3396 = vmatprep.subr.bf16.mxu1 %v3940_v4 }
  0xe4   :  { %3087 = vmatpush3.bf16.msra.mxu0 %v3543_v28 }
  0xe5   :  { %473 = vmatmul.mubr.bf16.vlgmr.msra.gmra.mrb[0].mxu1 %v221_v26 }
  0xe6   :  { %3150 = vmatprep.mubr.msk.f32.mxu1 %vm3939_vm0, %v3938_v1 }
  0xe7   :  { %3089 = vmatmul.mubr.bf16.vlgmr.msra.gmra.mrb[0].mxu0 %v221_v26 }
 0x1b8   :  { %v474_v36 = vpop.f32.mrb[0].mxu1 }
 0x1b9   :  { %v476_v37 = vpop.f32.mrb[1].mxu1  ;;  %v475_v38 = vadd.f32 %v474_v36, %v353_v34 }
 0x1ba   :  { %v477_v39 = vadd.f32 %v476_v37, %v357_v35  ;;  %v478_v40 = vpop.f32.mrb[2].mxu1  ;;  %v4252_v45 = vpop.f32.mrb[0].mxu0 }
 0x1bb   :  { %v480_v41 = vpop.f32.mrb[3].mxu1  ;;  %483 = vxpose.xlu0.b32.start.end [1/1] (short) %v475_v38, 128  ;;  %v479_v43 = vadd.f32 %v478_v40, %v353_v34  ;;  %v3090_v46 = vpop.f32.mrb[1].mxu0 }
 0x1bc   :  { %v4245_v42 = vadd.f32 %v480_v41, %v357_v35  ;;  %3092 = vmatprep.subr.mxu0 %v477_v39  ;;  %v327_v47 = vpop.f32.mrb[2].mxu0  ;;  %v4305_v35 = vld [vmem:[#allocation7 + $0x30] sm:$0xff]  ;;  %v4312_v46 = vld [vmem:[#allocation7 + $0x40] sm:$0xff] }
 0x1bd   :  { %3093 = vmatpush3.msra.mxu0 %v477_v39  ;;  %v4255_v48 = vadd.f32 %v4250_v44, %v327_v47  ;;  %v3091_v49 = vpop.f32.mrb[3].mxu0 }
 0x1be   :  { %3420 = vmatprep.subr.bf16.mxu0 %v3940_v4 }
 0x1f8   :  { %795 = vxpose.xlu0.b32.start.end [1/1] (short) %v479_v43, 128  ;;  %v4310_v43 = vld [vmem:[#allocation7 + $0x48] sm:$0xff] }
 0x23b   :  { %v499_v50 = vpop.trf.xlu0 }
 0x23c   :  { %3094 = vmatprep.mubr.msk.f32.mxu0 %vm515_vm1, %v499_v50 }
 0x23f   :  { %v500_v51 = vpop.trf.xlu0 }
 0x240   :  { %3095 = vmatmul.mubr.msk.f32.vlgmr.msra.gmra.mrb[4].mxu0 %vm515_vm1, %v500_v51 }
 0x243   :  { %v501_v52 = vpop.trf.xlu0 }
 0x244   :  { %3097 = vmatprep.mubr.msk.f32.mxu0 %vm515_vm1, %v501_v52 }
 0x247   :  { %v502_v53 = vpop.trf.xlu0 }
 0x248   :  { %3098 = vmatmul.mubr.msk.f32.gmra.mrb[6].mxu0 %vm515_vm1, %v502_v53 }
 0x24b   :  { %v503_v54 = vpop.trf.xlu0 }
 0x24c   :  { %3100 = vmatprep.mubr.msk.f32.mxu0 %vm515_vm1, %v503_v54  ;;  %v4317_v54 = vld [vmem:[#allocation7 + $0x58] sm:$0xff] }
 0x24f   :  { %v504_v55 = vpop.trf.xlu0 }
 0x250   :  { %3101 = vmatmul.mubr.msk.f32.gmra.mrb[8].mxu0 %vm515_vm1, %v504_v55  ;;  %v4319_v55 = vld [vmem:[#allocation7 + $0x50] sm:$0xff] }
 0x253   :  { %v505_v56 = vpop.trf.xlu0 }
 0x254   :  { %3103 = vmatprep.mubr.msk.f32.mxu0 %vm515_vm1, %v505_v56 }
 0x257   :  { %v506_v57 = vpop.trf.xlu0 }
 0x258   :  { %3104 = vmatmul.mubr.msk.f32.gmra.mrb[10].mxu0 %vm515_vm1, %v506_v57 }
 0x25b   :  { %v507_v58 = vpop.trf.xlu0 }
 0x25c   :  { %3106 = vmatprep.mubr.msk.f32.mxu0 %vm515_vm1, %v507_v58 }
 0x25f   :  { %v508_v59 = vpop.trf.xlu0 }
 0x260   :  { %3107 = vmatmul.mubr.msk.f32.gmra.mrb[12].mxu0 %vm515_vm1, %v508_v59 }
 0x263   :  { %v509_v60 = vpop.trf.xlu0 }
 0x264   :  { %3109 = vmatprep.mubr.msk.f32.mxu0 %vm515_vm1, %v509_v60 }
 0x267   :  { %v510_v61 = vpop.trf.xlu0 }
 0x268   :  { %3110 = vmatmul.mubr.msk.f32.gmra.mrb[14].mxu0 %vm515_vm1, %v510_v61 }
 0x26b   :  { %v511_v62 = vpop.trf.xlu0 }
 0x26c   :  { %3112 = vmatprep.mubr.msk.f32.mxu0 %vm515_vm1, %v511_v62  ;;  %v4324_v62 = vld [vmem:[#allocation7 + $0x68] sm:$0xff] }
 0x26f   :  { %v512_v63 = vpop.trf.xlu0 }
 0x270   :  { %3113 = vmatmul.mubr.msk.f32.gmra.mrb[16].mxu0 %vm515_vm1, %v512_v63 }
 0x273   :  { %v513_v2 = vpop.trf.xlu0 }
 0x274   :  { %3115 = vmatprep.mubr.msk.f32.mxu0 %vm515_vm1, %v513_v2  ;;  %v4326_v2 = vld [vmem:[#allocation7 + $0x60] sm:$0xff] }
 0x277   :  { %v514_v3 = vpop.trf.xlu0 }
 0x278   :  { %3116 = vmatmul.mubr.msk.f32.gmra.mrb[18].mxu0 %vm515_vm1, %v514_v3 }
 0x279   :  { %3211 = vmatprep.mubr.msk.f32.mxu0 %vm3939_vm0, %v3938_v1 }
 0x27b   :  { %v4283_v12 = vpop.trf.xlu0 }
 0x27f   :  { %v4292_v19 = vpop.trf.xlu0 }
 0x283   :  { %v4299_v26 = vpop.trf.xlu0 }
 0x287   :  { %v814_v34 = vpop.trf.xlu0 }
 0x28b   :  { %v815_v41 = vpop.trf.xlu0 }
 0x28f   :  { %v816_v52 = vpop.trf.xlu0 }
 0x293   :  { %v817_v57 = vpop.trf.xlu0 }
 0x297   :  { %v818_v63 = vpop.trf.xlu0 }
 0x313   :  { %v3096_v7 = vpop.f32.mrb[4].mxu0 }
 0x314   :  { %v710_v8 = vmul.f32 %v3096_v7, %v4277_v5  ;;  %v630_v9 = vpop.f32.mrb[5].mxu0 }
 0x315   :  { %v709_v10 = vmul.f32 %v630_v9, %v4279_v6 }
 0x317   :  { %v3397_v11 = vpack.c.bf16 %v710_v8, %v709_v10 }
 0x319   :  { %3398 = vmatpush3.bf16.msra.mxu1 %v3397_v11  ;;  %v819_v11 = vpop.trf.xlu0 }
 0x31a   :  { %3399 = vmatprep.subr.bf16.mxu1 %v3940_v4 }
 0x31b   :  { %v3099_v15 = vpop.f32.mrb[6].mxu0 }
 0x31c   :  { %v712_v16 = vmul.f32 %v3099_v15, %v4285_v13  ;;  %v640_v17 = vpop.f32.mrb[7].mxu0  ;;  %v4331_v15 = vld [vmem:[#allocation7 + $0x78] sm:$0xff] }
 0x31d   :  { %v711_v18 = vmul.f32 %v640_v17, %v4287_v14 }
 0x31f   :  { %v3400_v20 = vpack.c.bf16 %v712_v16, %v711_v18  ;;  %v4333_v16 = vld [vmem:[#allocation7 + $0x70] sm:$0xff] }
 0x321   :  { %3401 = vmatpush3.bf16.msra.mxu1 %v3400_v20 }
 0x322   :  { %3402 = vmatprep.subr.bf16.mxu1 %v3940_v4 }
 0x323   :  { %v3102_v25 = vpop.f32.mrb[8].mxu0 }
 0x324   :  { %v714_v27 = vmul.f32 %v3102_v25, %v4294_v21  ;;  %v650_v28 = vpop.f32.mrb[9].mxu0 }
 0x325   :  { %v713_v29 = vmul.f32 %v650_v28, %v4296_v22  ;;  %v325_v28 = vadd.f32 %v4250_v44, %v4252_v45 }
 0x327   :  { %v3403_v30 = vpack.c.bf16 %v714_v27, %v713_v29  ;;  %v820_v27 = vpop.trf.xlu0 }
 0x329   :  { %3404 = vmatpush3.bf16.msra.mxu1 %v3403_v30  ;;  %v331_v30 = vmul.f32 0.17677669, %v325_v28 }
 0x32a   :  { %3405 = vmatprep.subr.bf16.mxu1 %v3940_v4 }
 0x32b   :  { %v3105_v36 = vpop.f32.mrb[10].mxu0 }
 0x32c   :  { %v716_v37 = vmul.f32 %v3105_v36, %v4303_v32  ;;  %v660_v38 = vpop.f32.mrb[11].mxu0  ;;  %v821_v36 = vpop.trf.xlu0 }
 0x32d   :  { %v715_v39 = vmul.f32 %v660_v38, %v4305_v35  ;;  %v3547_v38 = vld [vmem:[#allocation11 + $0x18] sm:$0xff]  }
 0x32f   :  { %v3406_v40 = vpack.c.bf16 %v716_v37, %v715_v39  ;;  %v3546_v37 = vld [vmem:[#allocation11 + $0x10] sm:$0xff]   ;;  %v3548_v39 = vld [vmem:[#allocation11 + $0x20] sm:$0xff]  }
 0x330   :  { %v822_v44 = vpop.trf.xlu0 }
 0x331   :  { %3407 = vmatpush3.bf16.msra.mxu1 %v3406_v40  ;;  %v3549_v40 = vld [vmem:[#allocation11 + $0x28] sm:$0xff]  }
 0x332   :  { %3408 = vmatprep.subr.bf16.mxu1 %v3940_v4 }
 0x333   :  { %v3108_v47 = vpop.f32.mrb[12].mxu0 }
 0x334   :  { %v718_v49 = vmul.f32 %v3108_v47, %v4310_v43  ;;  %v670_v50 = vpop.f32.mrb[13].mxu0  ;;  %v823_v45 = vpop.trf.xlu0  ;;  %v3551_v47 = vld [vmem:[#allocation11 + $0x38] sm:$0xff]  }
 0x335   :  { %v717_v51 = vmul.f32 %v670_v50, %v4312_v46 }
 0x337   :  { %v3409_v53 = vpack.c.bf16 %v718_v49, %v717_v51 }
 0x339   :  { %3410 = vmatpush3.bf16.msra.mxu1 %v3409_v53 }
 0x33a   :  { %3411 = vmatprep.subr.bf16.mxu1 %v3940_v4 }
 0x33b   :  { %v3111_v56 = vpop.f32.mrb[14].mxu0 }
 0x33c   :  { %v720_v58 = vmul.f32 %v3111_v56, %v4317_v54  ;;  %v680_v59 = vpop.f32.mrb[15].mxu0 }
 0x33d   :  { %v719_v60 = vmul.f32 %v680_v59, %v4319_v55 }
 0x33f   :  { %v3412_v61 = vpack.c.bf16 %v720_v58, %v719_v60 }
 0x341   :  { %3413 = vmatpush3.bf16.msra.mxu1 %v3412_v61 }
 0x342   :  { %3414 = vmatprep.subr.bf16.mxu1 %v3940_v4 }
 0x343   :  { %v3114_v3 = vpop.f32.mrb[16].mxu0 }
 0x344   :  { %v722_v7 = vmul.f32 %v3114_v3, %v4324_v62  ;;  %v690_v8 = vpop.f32.mrb[17].mxu0 }
 0x345   :  { %v721_v9 = vmul.f32 %v690_v8, %v4326_v2 }
 0x347   :  { %v3415_v10 = vpack.c.bf16 %v722_v7, %v721_v9 }
 0x349   :  { %3416 = vmatpush3.bf16.msra.mxu1 %v3415_v10 }
 0x34a   :  { %3417 = vmatprep.subr.bf16.mxu1 %v3940_v4 }
 0x34b   :  { %v3117_v17 = vpop.f32.mrb[18].mxu0 }
 0x34c   :  { %v724_v18 = vmul.f32 %v3117_v17, %v4331_v15  ;;  %v700_v20 = vpop.f32.mrb[19].mxu0 }
 0x34d   :  { %v723_v25 = vmul.f32 %v700_v20, %v4333_v16 }
 0x34f   :  { %v3418_v29 = vpack.c.bf16 %v724_v18, %v723_v25 }
 0x351   :  { %3419 = vmatpush3.bf16.msra.mxu1 %v3418_v29 }
 0x352   :  { %3153 = vmatprep.subr.mxu1 %v4245_v42 }
 0x354   :  { %3151 = vmatmul.mubr.f32.vlgmr.msra.gmra.mrb[4].mxu1 %v331_v30 }
 0x355   :  { %3154 = vmatpush3.msra.mxu1 %v4245_v42  ;;  %3155 = vmatprep.mubr.msk.f32.mxu1 %vm515_vm1, %v4283_v12  ;;  %v824_v42 = vpop.trf.xlu0 }
 0x356   :  { %3214 = vmatprep.subr.bf16.mxu1 %v3938_v1 }
 0x358   :  { %3156 = vmatmul.mubr.msk.f32.vlgmr.msra.gmra.mrb[6].mxu1 %vm515_vm1, %v4292_v19 }
 0x359   :  { %3158 = vmatprep.mubr.msk.f32.mxu1 %vm515_vm1, %v4299_v26  ;;  %v825_v12 = vpop.trf.xlu0  ;;  %v3544_v26 = vld [vmem:[#allocation11] sm:$0xff]  }
 0x35a   :  { %3215 = vmatpush3.bf16.msra.mxu1 %v3544_v26 }
 0x35b   :  { %3216 = vmatprep.subr.bf16.mxu1 %v3938_v1 }
 0x35c   :  { %3159 = vmatmul.mubr.msk.f32.gmra.mrb[8].mxu1 %vm515_vm1, %v814_v34  ;;  %v3545_v34 = vld [vmem:[#allocation11 + $0x8] sm:$0xff]  }
 0x35d   :  { %3161 = vmatprep.mubr.msk.f32.mxu1 %vm515_vm1, %v815_v41  ;;  %v826_v19 = vpop.trf.xlu0  ;;  %v3550_v41 = vld [vmem:[#allocation11 + $0x30] sm:$0xff]  }
 0x35e   :  { %3217 = vmatpush3.bf16.msra.mxu1 %v3545_v34 }
 0x35f   :  { %3218 = vmatprep.subr.bf16.mxu1 %v3938_v1 }
 0x360   :  { %3162 = vmatmul.mubr.msk.f32.gmra.mrb[10].mxu1 %vm515_vm1, %v816_v52 }
 0x361   :  { %3164 = vmatprep.mubr.msk.f32.mxu1 %vm515_vm1, %v817_v57 }
 0x362   :  { %3219 = vmatpush3.bf16.msra.mxu1 %v3546_v37 }
 0x363   :  { %3220 = vmatprep.subr.bf16.mxu1 %v3938_v1 }
 0x364   :  { %3165 = vmatmul.mubr.msk.f32.gmra.mrb[12].mxu1 %vm515_vm1, %v818_v63 }
 0x365   :  { %3167 = vmatprep.mubr.msk.f32.mxu1 %vm515_vm1, %v819_v11 }
 0x366   :  { %3221 = vmatpush3.bf16.msra.mxu1 %v3547_v38 }
 0x367   :  { %3222 = vmatprep.subr.bf16.mxu1 %v3938_v1 }
 0x368   :  { %3168 = vmatmul.mubr.msk.f32.gmra.mrb[14].mxu1 %vm515_vm1, %v820_v27 }
 0x369   :  { %3170 = vmatprep.mubr.msk.f32.mxu1 %vm515_vm1, %v821_v36 }
 0x36a   :  { %3223 = vmatpush3.bf16.msra.mxu1 %v3548_v39 }
 0x36b   :  { %3224 = vmatprep.subr.bf16.mxu1 %v3938_v1 }
 0x36c   :  { %3171 = vmatmul.mubr.msk.f32.gmra.mrb[16].mxu1 %vm515_vm1, %v822_v44 }
 0x36d   :  { %3173 = vmatprep.mubr.msk.f32.mxu1 %vm515_vm1, %v823_v45 }
 0x36e   :  { %3225 = vmatpush3.bf16.msra.mxu1 %v3549_v40 }
 0x36f   :  { %3226 = vmatprep.subr.bf16.mxu1 %v3938_v1 }
 0x370   :  { %3174 = vmatmul.mubr.msk.f32.gmra.mrb[18].mxu1 %vm515_vm1, %v824_v42 }
 0x371   :  { %3176 = vmatprep.mubr.msk.f32.mxu1 %vm515_vm1, %v825_v12 }
 0x372   :  { %3227 = vmatpush3.bf16.msra.mxu1 %v3550_v41 }
 0x373   :  { %3228 = vmatprep.subr.bf16.mxu1 %v3938_v1 }
 0x374   :  { %3177 = vmatmul.mubr.msk.f32.gmra.mrb[20].mxu1 %vm515_vm1, %v826_v19 }
 0x375   :  { %3230 = vmatprep.mubr.msk.bf16.mxu1 %vm3939_vm0, %v3938_v1 }
 0x376   :  { %3229 = vmatpush3.bf16.msra.mxu1 %v3551_v47 }
 0x427   :  { %v4371_v49 = vpop.f32.mrb[4].mxu1 }
 0x428   :  { %v3152_v50 = vpop.f32.mrb[5].mxu1 }
 0x42b   :  { %v3157_v51 = vpop.f32.mrb[6].mxu1 }
 0x42c   :  { %v1021_v52 = vmul.f32 %v3157_v51, %v4277_v5  ;;  %v941_v53 = vpop.f32.mrb[7].mxu1 }
 0x42d   :  { %v1020_v56 = vmul.f32 %v941_v53, %v4279_v6  ;;  %v3554_v53 = vld [vmem:[#allocation14 + $0x4] ss:$8 sps:$4 sm:$0xff]  }
 0x42e   :  { %1485 = vmatprep.subr.bf16.mxu1 %v3554_v53  ;;  %v2774_v53 = vld [vmem:[%s4598_s11 + $0x3] ss:$2 sm:$0x3] }
 0x42f   :  { %v3421_v57 = vpack.c.bf16 %v1021_v52, %v1020_v56  ;;  %v3160_v58 = vpop.f32.mrb[8].mxu1  ;;  %v332_v52 = vmul.f32 0.17677669, %v4255_v48  ;;  %v3560_v48 = vld [vmem:[#allocation14 + $0x24] ss:$8 sps:$4 sm:$0xff]  }
 0x430   :  { %v1023_v59 = vmul.f32 %v3160_v58, %v4285_v13  ;;  %v951_v60 = vpop.f32.mrb[9].mxu1 }
 0x431   :  { %v1022_v61 = vmul.f32 %v951_v60, %v4287_v14  ;;  %3422 = vmatpush3.bf16.msra.mxu0 %v3421_v57  ;;  %v3552_v57 = vld [vmem:[#allocation14] ss:$8 sps:$4 sm:$0xff]   ;;  %v3557_v60 = vld [vmem:[#allocation14 + $0x14] ss:$8 sps:$4 sm:$0xff]  }
 0x432   :  { %3423 = vmatprep.subr.bf16.mxu0 %v3940_v4 }
 0x433   :  { %v3424_v63 = vpack.c.bf16 %v1023_v59, %v1022_v61  ;;  %v3163_v3 = vpop.f32.mrb[10].mxu1  ;;  %v3555_v61 = vld [vmem:[#allocation14 + $0x10] ss:$8 sps:$4 sm:$0xff]  }
 0x434   :  { %v1025_v7 = vmul.f32 %v3163_v3, %v4294_v21  ;;  %v961_v8 = vpop.f32.mrb[11].mxu1  ;;  %v3563_v3 = vld [vmem:[#allocation14 + $0x34] ss:$8 sps:$4 sm:$0xff]  }
 0x435   :  { %v1024_v9 = vmul.f32 %v961_v8, %v4296_v22  ;;  %3425 = vmatpush3.bf16.msra.mxu0 %v3424_v63  ;;  %v3558_v63 = vld [vmem:[#allocation14 + $0x20] ss:$8 sps:$4 sm:$0xff]   ;;  %v3566_v8 = vld [vmem:[#allocation14 + $0x44] ss:$8 sps:$4 sm:$0xff]  }
 0x436   :  { %3426 = vmatprep.subr.bf16.mxu0 %v3940_v4 }
 0x437   :  { %v3427_v10 = vpack.c.bf16 %v1025_v7, %v1024_v9  ;;  %v3166_v11 = vpop.f32.mrb[12].mxu1  ;;  %v3561_v7 = vld [vmem:[#allocation14 + $0x30] ss:$8 sps:$4 sm:$0xff]   ;;  %v3564_v9 = vld [vmem:[#allocation14 + $0x40] ss:$8 sps:$4 sm:$0xff]  }
 0x438   :  { %v1027_v17 = vmul.f32 %v3166_v11, %v4303_v32  ;;  %v971_v18 = vpop.f32.mrb[13].mxu1  ;;  %v3572_v11 = vld [vmem:[#allocation14 + $0x64] ss:$8 sps:$4 sm:$0xff]  }
 0x439   :  { %v1026_v20 = vmul.f32 %v971_v18, %v4305_v35  ;;  %3428 = vmatpush3.bf16.msra.mxu0 %v3427_v10  ;;  %v3567_v10 = vld [vmem:[#allocation14 + $0x50] ss:$8 sps:$4 sm:$0xff]   ;;  %v3575_v18 = vld [vmem:[#allocation14 + $0x74] ss:$8 sps:$4 sm:$0xff]  }
 0x43a   :  { %3429 = vmatprep.subr.bf16.mxu0 %v3940_v4 }
 0x43b   :  { %v3430_v25 = vpack.c.bf16 %v1027_v17, %v1026_v20  ;;  %v3169_v27 = vpop.f32.mrb[14].mxu1  ;;  %v3570_v17 = vld [vmem:[#allocation14 + $0x60] ss:$8 sps:$4 sm:$0xff]   ;;  %v3573_v20 = vld [vmem:[#allocation14 + $0x70] ss:$8 sps:$4 sm:$0xff]  }
 0x43c   :  { %v1029_v28 = vmul.f32 %v3169_v27, %v4310_v43  ;;  %v981_v29 = vpop.f32.mrb[15].mxu1  ;;  %v217_v27 = vld [vmem:[#allocation5 + $0x8] sm:$0xff] }
 0x43d   :  { %v1028_v30 = vmul.f32 %v981_v29, %v4312_v46  ;;  %3431 = vmatpush3.bf16.msra.mxu0 %v3430_v25  ;;  %v216_v25 = vld [vmem:[#allocation5] sm:$0xff]  ;;  %v3576_v29 = vld [vmem:[#allocation13] sm:$0xff]  }
 0x43e   :  { %3432 = vmatprep.subr.bf16.mxu0 %v3940_v4 }
 0x43f   :  { %v3433_v36 = vpack.c.bf16 %v1029_v28, %v1028_v30  ;;  %v3172_v44 = vpop.f32.mrb[16].mxu1  ;;  %v1377_v28 = vpack.c.bf16 %v217_v27, %v216_v25  ;;  %v3577_v30 = vld [vmem:[#allocation13 + $0x8] sm:$0xff]  }
 0x440   :  { %v1031_v45 = vmul.f32 %v3172_v44, %v4317_v54  ;;  %v991_v42 = vpop.f32.mrb[17].mxu1  ;;  %v3579_v44 = vld [vmem:[#allocation13 + $0x18] sm:$0xff]  }
 0x441   :  { %v1030_v12 = vmul.f32 %v991_v42, %v4319_v55  ;;  %3434 = vmatpush3.bf16.msra.mxu0 %v3433_v36  ;;  %v3578_v36 = vld [vmem:[#allocation13 + $0x10] sm:$0xff]   ;;  %v3581_v42 = vld [vmem:[#allocation13 + $0x28] sm:$0xff]  }
 0x442   :  { %3435 = vmatprep.subr.bf16.mxu0 %v3940_v4 }
 0x443   :  { %v3436_v19 = vpack.c.bf16 %v1031_v45, %v1030_v12  ;;  %v3175_v26 = vpop.f32.mrb[18].mxu1  ;;  %v3580_v45 = vld [vmem:[#allocation13 + $0x20] sm:$0xff]   ;;  %v3582_v12 = vld [vmem:[#allocation13 + $0x30] sm:$0xff]  }
 0x444   :  { %v1033_v34 = vmul.f32 %v3175_v26, %v4324_v62  ;;  %v1001_v37 = vpop.f32.mrb[19].mxu1  ;;  %v2763_v26 = vld [vmem:[%s4600_s13] ss:$0 sm:$0xff] }
 0x445   :  { %v1032_v38 = vmul.f32 %v1001_v37, %v4326_v2  ;;  %3437 = vmatpush3.bf16.msra.mxu0 %v3436_v19  ;;  %v3583_v19 = vld [vmem:[#allocation13 + $0x38] sm:$0xff]  }
 0x446   :  { %3438 = vmatprep.subr.bf16.mxu0 %v3940_v4 }
 0x447   :  { %v3439_v39 = vpack.c.bf16 %v1033_v34, %v1032_v38  ;;  %v3178_v40 = vpop.f32.mrb[20].mxu1 }
 0x448   :  { %v1035_v41 = vmul.f32 %v3178_v40, %v4331_v15  ;;  %v1011_v47 = vpop.f32.mrb[21].mxu1 }
 0x449   :  { %v1034_v50 = vmul.f32 %v1011_v47, %v4333_v16  ;;  %3440 = vmatpush3.bf16.msra.mxu0 %v3439_v39 }
 0x44a   :  { %3441 = vmatprep.subr.bf16.mxu0 %v3940_v4 }
 0x44b   :  { %v3442_v51 = vpack.c.bf16 %v1035_v41, %v1034_v50 }
 0x44d   :  { %3443 = vmatpush3.bf16.msra.mxu0 %v3442_v51 }
 0x44e   :  { %3234 = vmatprep.subr.bf16.mxu0 %v3938_v1 }
 0x450   :  { %3212 = vmatmul.mubr.f32.vlgmr.msra.gmra.mrb[20].mxu0 %v332_v52 }
 0x451   :  { %3250 = vmatprep.mubr.msk.bf16.mxu0 %vm3939_vm0, %v3938_v1  ;;  %3235 = vmatpush3.bf16.msra.mxu0 %v3576_v29 }
 0x452   :  { %3236 = vmatprep.subr.bf16.mxu0 %v3938_v1 }
 0x455   :  { %3237 = vmatpush3.bf16.msra.mxu0 %v3577_v30 }
 0x456   :  { %3238 = vmatprep.subr.bf16.mxu0 %v3938_v1 }
 0x459   :  { %3239 = vmatpush3.bf16.msra.mxu0 %v3578_v36 }
 0x45a   :  { %3240 = vmatprep.subr.bf16.mxu0 %v3938_v1 }
 0x45d   :  { %3241 = vmatpush3.bf16.msra.mxu0 %v3579_v44  ;;  %v2772_v44 = vld [vmem:[%s4600_s13 + $0x1] ss:$0 sm:$0xff] }
 0x45e   :  { %3242 = vmatprep.subr.bf16.mxu0 %v3938_v1 }
 0x461   :  { %3243 = vmatpush3.bf16.msra.mxu0 %v3580_v45 }
 0x462   :  { %3244 = vmatprep.subr.bf16.mxu0 %v3938_v1 }
 0x465   :  { %3245 = vmatpush3.bf16.msra.mxu0 %v3581_v42 }
 0x466   :  { %3246 = vmatprep.subr.bf16.mxu0 %v3938_v1 }
 0x469   :  { %3247 = vmatpush3.bf16.msra.mxu0 %v3582_v12 }
 0x46a   :  { %3248 = vmatprep.subr.bf16.mxu0 %v3938_v1 }
 0x46d   :  { %3249 = vmatpush3.bf16.msra.mxu0 %v3583_v19 }
 0x523   :  { %v1102_v56 = vpop.f32.mrb[20].mxu0 }
 0x524   :  { %v1106_v58 = vpack.c.bf16 %v1102_v56, %v4371_v49  ;;  %v3213_v59 = vpop.f32.mrb[21].mxu0  ;;  %v3569_v49 = vld [vmem:[#allocation14 + $0x54] ss:$8 sps:$4 sm:$0xff]   ;;  %v1402_v56 = vrot.slane %v2774_v53, %v4241_v33 }
 0x526   :  { %3231 = vmatmul.mubr.bf16.vlgmr.msra.gmra.mrb[24].mxu1 %v1106_v58 }
 0x527   :  { %1486 = vmatpush1.bf16.msra.mxu1 %v3552_v57  ;;  %1517 = vmatprep.mubr.bf16.mxu1 %v3937_v0  ;;  %v1398_v57 = vrot.slane %v2774_v53, %v4236_v31 }
 0x528   :  { %1487 = vmatprep.subr.bf16.mxu1 %v3557_v60 }
 0x52b   :  { %1488 = vmatpush1.bf16.msra.mxu1 %v3555_v61 }
 0x52c   :  { %1489 = vmatprep.subr.bf16.mxu1 %v3560_v48 }
 0x52f   :  { %1490 = vmatpush1.bf16.msra.mxu1 %v3558_v63 }
 0x530   :  { %1491 = vmatprep.subr.bf16.mxu1 %v3563_v3 }
 0x533   :  { %1492 = vmatpush1.bf16.msra.mxu1 %v3561_v7 }
 0x534   :  { %1493 = vmatprep.subr.bf16.mxu1 %v3566_v8 }
 0x537   :  { %1494 = vmatpush1.bf16.msra.mxu1 %v3564_v9 }
 0x538   :  { %1495 = vmatprep.subr.bf16.mxu1 %v3569_v49 }
 0x53b   :  { %1496 = vmatpush1.bf16.msra.mxu1 %v3567_v10 }
 0x53c   :  { %1497 = vmatprep.subr.bf16.mxu1 %v3572_v11 }
 0x53f   :  { %1498 = vmatpush1.bf16.msra.mxu1 %v3570_v17 }
 0x540   :  { %1499 = vmatprep.subr.bf16.mxu1 %v3575_v18 }
 0x543   :  { %1500 = vmatpush1.bf16.msra.mxu1 %v3573_v20 }
 0x546   :  { %1518 = vmatmul.mubr.bf16.vlgmr.msra.gmra.mrb[28].mxu1 %v1377_v28 }
 0x5f9   :  { %v1210_v34 = vpop.f32.mrb[24].mxu1 }
 0x5fa   :  { %v1211_v37 = vadd.f32 %v2763_v26, %v1210_v34  ;;  %v3232_v38 = vpop.f32.mrb[25].mxu1  ;;  %v2773_v34 = vld [vmem:[%s4600_s13 + $0x2] ss:$0 sm:$0xff] }
 0x5fb   :  { %v1213_v39 = vpop.f32.mrb[26].mxu1 }
 0x5fc   :  { %v1217_v40 = vadd.f32 %v1211_v37, %v4222_v23  ;;  %v1214_v41 = vadd.f32 %v2763_v26, %v1213_v39  ;;  %v3233_v47 = vpop.f32.mrb[27].mxu1 }
 0x5fe   :  { %1219 = vadd.xlane.f32.xlu1 %v1217_v40  ;;  %v1218_v50 = vadd.f32 %v1214_v41, %v4224_v24  ;;  %v1226_v51 = vmul.f32 %v1217_v40, %v1217_v40 }
 0x600   :  { %v1227_v52 = vmul.f32 %v1218_v50, %v1218_v50 }
 0x602   :  { %1221 = vadd.xlane.f32.xlu1 %v1218_v50 }
 0x606   :  { %1228 = vadd.xlane.f32.xlu1 %v1226_v51 }
 0x60a   :  { %1230 = vadd.xlane.f32.xlu1 %v1227_v52 }
 0x619   :  { %v1519_v58 = vpop.f32.mrb[28].mxu1 }
 0x61a   :  { %v1521_v23 = vpop.f32.mrb[29].mxu1  ;;  %v1520_v63 = vadd.f32 %v1519_v58, %v1398_v57 }
 0x61b   :  { %v1522_v59 = vadd.f32 %v1521_v23, %v1402_v56  ;;  %v1523_v60 = vpop.f32.mrb[30].mxu1 }
 0x61c   :  { %v1524_v61 = vadd.f32 %v1523_v60, %v1398_v57  ;;  %v1525_v48 = vpop.f32.mrb[31].mxu1 }
 0x61d   :  { %v1526_v24 = vadd.f32 %v1525_v48, %v1402_v56  ;;  %3254 = vmatprep.subr.mxu0 %v1522_v59 }
 0x61e   :  { %1839 = vxpose.xlu0.b32.start.end [1/1] (short) %v1524_v61, 128 }
 0x61f   :  { %3315 = vmatprep.subr.mxu1 %v1526_v24 }
 0x620   :  { %3316 = vmatpush3.msra.mxu1 %v1526_v24 }
 0x621   :  { %3468 = vmatprep.subr.bf16.mxu1 %v3940_v4 }
 0x63d   :  { %1528 = vxpose.xlu1.b32.start.end [1/1] (short) %v1520_v63, 128 }
 0x68b   :  { %v1220_v3 = vpop.xlane.xlu1 %1219 }
 0x68c   :  { %v1224_v8 = vmul.f32 0.0078125, %v1220_v3 }
 0x68e   :  { %v1234_v49 = vmul.f32 %v1224_v8, %v1224_v8 }
 0x68f   :  { %v1222_v7 = vpop.xlane.xlu1 %1221 }
 0x690   :  { %v1225_v10 = vmul.f32 0.0078125, %v1222_v7 }
 0x692   :  { %v1235_v20 = vmul.f32 %v1225_v10, %v1225_v10 }
 0x693   :  { %v1229_v9 = vpop.xlane.xlu1 %1228 }
 0x694   :  { %v1232_v11 = vmul.f32 0.0078125, %v1229_v9 }
 0x696   :  { %v1236_v17 = vsub.f32 %v1232_v11, %v1234_v49 }
 0x697   :  { %v1231_v18 = vpop.xlane.xlu1 %1230 }
 0x698   :  { %v1238_v25 = vadd.f32 1e-05, %v1236_v17  ;;  %v1233_v27 = vmul.f32 0.0078125, %v1231_v18 }
 0x69a   :  { %3632 = vrsqrt.f32 %v1238_v25  ;;  %v1237_v28 = vsub.f32 %v1233_v27, %v1235_v20 }
 0x69c   :  { %v1239_v29 = vadd.f32 1e-05, %v1237_v28 }
 0x69e   :  { %3634 = vrsqrt.f32 %v1239_v29  ;;  %v1855_v30 = vpop.trf.xlu0 }
 0x69f   :  { %3317 = vmatprep.mubr.msk.f32.mxu1 %vm515_vm1, %v1855_v30 }
 0x6a2   :  { %v1856_v36 = vpop.trf.xlu0 }
 0x6a3   :  { %3318 = vmatmul.mubr.msk.f32.vlgmr.msra.gmra.mrb[22].mxu1 %vm515_vm1, %v1856_v36 }
 0x6a4   :  { %v3633_v45 = vpop.eup %3632 }
 0x6a5   :  { %v1247_v42 = vmul.f32 %v3633_v45, %v2772_v44 }
 0x6a6   :  { %v1857_v12 = vpop.trf.xlu0 }
 0x6a7   :  { %v1252_v19 = vmul.f32 %v1247_v42, %v1224_v8  ;;  %3320 = vmatprep.mubr.msk.f32.mxu1 %vm515_vm1, %v1857_v12  ;;  %v1249_v47 = vmul.f32 %v1247_v42, %v1217_v40 }
 0x6a8   :  { %v3635_v26 = vpop.eup %3634 }
 0x6a9   :  { %v1248_v37 = vmul.f32 %v3635_v26, %v2772_v44  ;;  %v1258_v41 = vsub.f32 %v2773_v34, %v1252_v19 }
 0x6aa   :  { %v1858_v38 = vpop.trf.xlu0 }
 0x6ab   :  { %v1253_v39 = vmul.f32 %v1248_v37, %v1225_v10  ;;  %3321 = vmatmul.mubr.msk.f32.gmra.mrb[32].mxu1 %vm515_vm1, %v1858_v38  ;;  %v1250_v51 = vmul.f32 %v1248_v37, %v1218_v50  ;;  %v4430_v56 = vadd.f32 %v1258_v41, %v1249_v47 }
 0x6ad   :  { %v1259_v52 = vsub.f32 %v2773_v34, %v1253_v39 }
 0x6ae   :  { %v1859_v53 = vpop.trf.xlu0 }
 0x6af   :  { %v4432_v57 = vadd.f32 %v1259_v52, %v1250_v51  ;;  %3323 = vmatprep.mubr.msk.f32.mxu1 %vm515_vm1, %v1859_v53 }
 0x6b1   :  { %v1265_v58 = vpack.c.bf16 %v4432_v57, %v4430_v56 }
 0x6b2   :  { %v1860_v23 = vpop.trf.xlu0 }
 0x6b3   :  { %3251 = vmatmul.mubr.bf16.vlgmr.msra.gmra.mrb[24].mxu0 %v1265_v58  ;;  %3324 = vmatmul.mubr.msk.f32.gmra.mrb[34].mxu1 %vm515_vm1, %v1860_v23 }
 0x6b4   :  { %3255 = vmatpush3.msra.mxu0 %v1522_v59 }
 0x6b5   :  { %3444 = vmatprep.subr.bf16.mxu0 %v3940_v4 }
 0x6b6   :  { %v1861_v40 = vpop.trf.xlu0 }
 0x6b7   :  { %3326 = vmatprep.mubr.msk.f32.mxu1 %vm515_vm1, %v1861_v40 }
 0x6ba   :  { %v1862_v50 = vpop.trf.xlu0 }
 0x6bb   :  { %3327 = vmatmul.mubr.msk.f32.gmra.mrb[36].mxu1 %vm515_vm1, %v1862_v50 }
 0x6bd   :  { %v1544_v60 = vpop.trf.xlu1 }
 0x6be   :  { %v1863_v61 = vpop.trf.xlu0  ;;  %3256 = vmatprep.mubr.msk.f32.mxu0 %vm515_vm1, %v1544_v60 }
 0x6bf   :  { %3329 = vmatprep.mubr.msk.f32.mxu1 %vm515_vm1, %v1863_v61 }
 0x6c1   :  { %v1545_v48 = vpop.trf.xlu1 }
 0x6c2   :  { %v1864_v24 = vpop.trf.xlu0  ;;  %3257 = vmatmul.mubr.msk.f32.vlgmr.msra.gmra.mrb[22].mxu0 %vm515_vm1, %v1545_v48 }
 0x6c3   :  { %3330 = vmatmul.mubr.msk.f32.gmra.mrb[38].mxu1 %vm515_vm1, %v1864_v24 }
 0x6c5   :  { %v1546_v59 = vpop.trf.xlu1 }
 0x6c6   :  { %v1865_v63 = vpop.trf.xlu0  ;;  %3259 = vmatprep.mubr.msk.f32.mxu0 %vm515_vm1, %v1546_v59 }
 0x6c7   :  { %3332 = vmatprep.mubr.msk.f32.mxu1 %vm515_vm1, %v1865_v63 }
 0x6c9   :  { %v1547_v3 = vpop.trf.xlu1 }
 0x6ca   :  { %v1866_v7 = vpop.trf.xlu0  ;;  %3260 = vmatmul.mubr.msk.f32.gmra.mrb[28].mxu0 %vm515_vm1, %v1547_v3 }
 0x6cb   :  { %3333 = vmatmul.mubr.msk.f32.gmra.mrb[40].mxu1 %vm515_vm1, %v1866_v7 }
 0x6cd   :  { %v1548_v8 = vpop.trf.xlu1 }
 0x6ce   :  { %v1867_v9 = vpop.trf.xlu0  ;;  %3262 = vmatprep.mubr.msk.f32.mxu0 %vm515_vm1, %v1548_v8 }
 0x6cf   :  { %3335 = vmatprep.mubr.msk.f32.mxu1 %vm515_vm1, %v1867_v9 }
 0x6d1   :  { %v1549_v49 = vpop.trf.xlu1 }
 0x6d2   :  { %v1868_v10 = vpop.trf.xlu0  ;;  %3263 = vmatmul.mubr.msk.f32.gmra.mrb[30].mxu0 %vm515_vm1, %v1549_v49 }
 0x6d3   :  { %3336 = vmatmul.mubr.msk.f32.gmra.mrb[42].mxu1 %vm515_vm1, %v1868_v10 }
 0x6d5   :  { %v1550_v11 = vpop.trf.xlu1 }
 0x6d6   :  { %v1869_v17 = vpop.trf.xlu0  ;;  %3265 = vmatprep.mubr.msk.f32.mxu0 %vm515_vm1, %v1550_v11 }
 0x6d7   :  { %3338 = vmatprep.mubr.msk.f32.mxu1 %vm515_vm1, %v1869_v17 }
 0x6d9   :  { %v1551_v18 = vpop.trf.xlu1 }
 0x6da   :  { %v1870_v20 = vpop.trf.xlu0  ;;  %3266 = vmatmul.mubr.msk.f32.gmra.mrb[32].mxu0 %vm515_vm1, %v1551_v18 }
 0x6db   :  { %3339 = vmatmul.mubr.msk.f32.gmra.mrb[44].mxu1 %vm515_vm1, %v1870_v20 }
 0x6dc   :  { %3373 = vmatprep.mubr.msk.f32.mxu1 %vm3939_vm0, %v3938_v1 }
 0x6dd   :  { %v1552_v25 = vpop.trf.xlu1 }
 0x6de   :  { %3268 = vmatprep.mubr.msk.f32.mxu0 %vm515_vm1, %v1552_v25 }
 0x6e1   :  { %v1553_v27 = vpop.trf.xlu1 }
 0x6e2   :  { %3269 = vmatmul.mubr.msk.f32.gmra.mrb[34].mxu0 %vm515_vm1, %v1553_v27 }
 0x6e5   :  { %v1554_v28 = vpop.trf.xlu1 }
 0x6e6   :  { %3271 = vmatprep.mubr.msk.f32.mxu0 %vm515_vm1, %v1554_v28 }
 0x6e9   :  { %v1555_v29 = vpop.trf.xlu1 }
 0x6ea   :  { %3272 = vmatmul.mubr.msk.f32.gmra.mrb[36].mxu0 %vm515_vm1, %v1555_v29 }
 0x6ed   :  { %v1556_v30 = vpop.trf.xlu1 }
 0x6ee   :  { %3274 = vmatprep.mubr.msk.f32.mxu0 %vm515_vm1, %v1556_v30 }
 0x6f1   :  { %v1557_v36 = vpop.trf.xlu1 }
 0x6f2   :  { %3275 = vmatmul.mubr.msk.f32.gmra.mrb[38].mxu0 %vm515_vm1, %v1557_v36 }
 0x6f5   :  { %v1558_v44 = vpop.trf.xlu1 }
 0x6f6   :  { %3277 = vmatprep.mubr.msk.f32.mxu0 %vm515_vm1, %v1558_v44 }
 0x6f9   :  { %v1559_v45 = vpop.trf.xlu1 }
 0x6fa   :  { %3278 = vmatmul.mubr.msk.f32.gmra.mrb[40].mxu0 %vm515_vm1, %v1559_v45 }
 0x6fb   :  { %3312 = vmatprep.mubr.msk.f32.mxu0 %vm3939_vm0, %v3938_v1 }
 0x776   :  { %v3319_v42 = vpop.f32.mrb[22].mxu1 }
 0x777   :  { %v2065_v12 = vmul.f32 %v3319_v42, %v4277_v5  ;;  %v1985_v19 = vpop.f32.mrb[23].mxu1 }
 0x778   :  { %v2064_v26 = vmul.f32 %v1985_v19, %v4279_v6 }
 0x77a   :  { %v3469_v34 = vpack.c.bf16 %v2065_v12, %v2064_v26 }
 0x77c   :  { %3470 = vmatpush3.bf16.msra.mxu1 %v3469_v34 }
 0x77d   :  { %3471 = vmatprep.subr.bf16.mxu1 %v3940_v4 }
 0x77e   :  { %v3322_v37 = vpop.f32.mrb[32].mxu1 }
 0x77f   :  { %v2067_v38 = vmul.f32 %v3322_v37, %v4285_v13  ;;  %v1995_v39 = vpop.f32.mrb[33].mxu1 }
 0x780   :  { %v2066_v41 = vmul.f32 %v1995_v39, %v4287_v14 }
 0x782   :  { %v3472_v47 = vpack.c.bf16 %v2067_v38, %v2066_v41 }
 0x784   :  { %3473 = vmatpush3.bf16.msra.mxu1 %v3472_v47 }
 0x785   :  { %3474 = vmatprep.subr.bf16.mxu1 %v3940_v4 }
 0x786   :  { %v4475_v51 = vpop.f32.mrb[24].mxu0  ;;  %v3325_v52 = vpop.f32.mrb[34].mxu1 }
 0x787   :  { %v3252_v53 = vpop.f32.mrb[25].mxu0  ;;  %v2069_v58 = vmul.f32 %v3325_v52, %v4294_v21  ;;  %v2005_v23 = vpop.f32.mrb[35].mxu1 }
 0x788   :  { %v4478_v40 = vpop.f32.mrb[26].mxu0  ;;  %v2068_v50 = vmul.f32 %v2005_v23, %v4296_v22 }
 0x789   :  { %v3253_v60 = vpop.f32.mrb[27].mxu0 }
 0x78a   :  { %v3475_v61 = vpack.c.bf16 %v2069_v58, %v2068_v50  ;;  %v2775_v50 = vld [vmem:[%s4598_s11 + $0x1] ss:$0 sm:$0xff] }
 0x78c   :  { %3476 = vmatpush3.bf16.msra.mxu1 %v3475_v61  ;;  %v1372_v61 = vadd.f32 %v2775_v50, %v4478_v40 }
 0x78d   :  { %3477 = vmatprep.subr.bf16.mxu1 %v3940_v4 }
 0x78e   :  { %v3328_v48 = vpop.f32.mrb[36].mxu1 }
 0x78f   :  { %v2071_v24 = vmul.f32 %v3328_v48, %v4303_v32  ;;  %v2015_v59 = vpop.f32.mrb[37].mxu1 }
 0x790   :  { %v2070_v63 = vmul.f32 %v2015_v59, %v4305_v35 }
 0x792   :  { %v3478_v3 = vpack.c.bf16 %v2071_v24, %v2070_v63 }
 0x794   :  { %3479 = vmatpush3.bf16.msra.mxu1 %v3478_v3 }
 0x795   :  { %v3258_v7 = vpop.f32.mrb[22].mxu0  ;;  %3480 = vmatprep.subr.bf16.mxu1 %v3940_v4 }
 0x796   :  { %v1754_v8 = vmul.f32 %v3258_v7, %v4277_v5  ;;  %v1674_v9 = vpop.f32.mrb[23].mxu0  ;;  %v3331_v49 = vpop.f32.mrb[38].mxu1 }
 0x797   :  { %v1753_v10 = vmul.f32 %v1674_v9, %v4279_v6  ;;  %v2073_v11 = vmul.f32 %v3331_v49, %v4310_v43  ;;  %v2025_v17 = vpop.f32.mrb[39].mxu1 }
 0x798   :  { %v2072_v18 = vmul.f32 %v2025_v17, %v4312_v46 }
 0x799   :  { %v3445_v20 = vpack.c.bf16 %v1754_v8, %v1753_v10 }
 0x79a   :  { %v3481_v25 = vpack.c.bf16 %v2073_v11, %v2072_v18 }
 0x79b   :  { %3446 = vmatpush3.bf16.msra.mxu0 %v3445_v20 }
 0x79c   :  { %3447 = vmatprep.subr.bf16.mxu0 %v3940_v4  ;;  %3482 = vmatpush3.bf16.msra.mxu1 %v3481_v25  ;;  %v1369_v25 = vadd.f32 %v2775_v50, %v4475_v51  ;;  %v3589_v51 = vld [vmem:[#allocation16 + $0x28] sm:$0xff]   ;;  %v3609_v50 = vld [vmem:[#allocation17 + $0x54] ss:$8 sps:$4 sm:$0xff]  }
 0x79d   :  { %v3261_v27 = vpop.f32.mrb[28].mxu0  ;;  %3483 = vmatprep.subr.bf16.mxu1 %v3940_v4 }
 0x79e   :  { %v1756_v5 = vmul.f32 %v3261_v27, %v4285_v13  ;;  %v1684_v28 = vpop.f32.mrb[29].mxu0  ;;  %v3334_v29 = vpop.f32.mrb[40].mxu1 }
 0x79f   :  { %v1755_v6 = vmul.f32 %v1684_v28, %v4287_v14  ;;  %v2075_v30 = vmul.f32 %v3334_v29, %v4317_v54  ;;  %v2035_v36 = vpop.f32.mrb[41].mxu1  ;;  %v3590_v28 = vld [vmem:[#allocation16 + $0x30] sm:$0xff]   ;;  %v3591_v29 = vld [vmem:[#allocation16 + $0x38] sm:$0xff]  }
 0x7a0   :  { %v2074_v44 = vmul.f32 %v2035_v36, %v4319_v55 }
 0x7a1   :  { %v3448_v45 = vpack.c.bf16 %v1756_v5, %v1755_v6  ;;  %v1375_v5 = vmul.f32 0.17677669, %v1369_v25 }
 0x7a2   :  { %v3484_v42 = vpack.c.bf16 %v2075_v30, %v2074_v44 }
 0x7a3   :  { %3449 = vmatpush3.bf16.msra.mxu0 %v3448_v45 }
 0x7a4   :  { %3450 = vmatprep.subr.bf16.mxu0 %v3940_v4  ;;  %3485 = vmatpush3.bf16.msra.mxu1 %v3484_v42  ;;  %v2832_v42 = vld [vmem:[%s4600_s13 + $0x3] ss:$0 sm:$0xff] }
 0x7a5   :  { %v3264_v12 = vpop.f32.mrb[30].mxu0  ;;  %3486 = vmatprep.subr.bf16.mxu1 %v3940_v4 }
 0x7a6   :  { %v1758_v13 = vmul.f32 %v3264_v12, %v4294_v21  ;;  %v1694_v19 = vpop.f32.mrb[31].mxu0  ;;  %v3337_v26 = vpop.f32.mrb[42].mxu1 }
 0x7a7   :  { %v1757_v14 = vmul.f32 %v1694_v19, %v4296_v22  ;;  %v2077_v34 = vmul.f32 %v3337_v26, %v4324_v62  ;;  %v2045_v37 = vpop.f32.mrb[43].mxu1 }
 0x7a8   :  { %v2076_v38 = vmul.f32 %v2045_v37, %v4326_v2 }
 0x7a9   :  { %v3451_v39 = vpack.c.bf16 %v1758_v13, %v1757_v14 }
 0x7aa   :  { %v3487_v41 = vpack.c.bf16 %v2077_v34, %v2076_v38 }
 0x7ab   :  { %3452 = vmatpush3.bf16.msra.mxu0 %v3451_v39 }
 0x7ac   :  { %3488 = vmatpush3.bf16.msra.mxu1 %v3487_v41  ;;  %3453 = vmatprep.subr.bf16.mxu0 %v3940_v4  ;;  %v3594_v41 = vld [vmem:[#allocation17 + $0x4] ss:$8 sps:$4 sm:$0xff]  }
 0x7ad   :  { %v3267_v47 = vpop.f32.mrb[32].mxu0  ;;  %3489 = vmatprep.subr.bf16.mxu1 %v3940_v4 }
 0x7ae   :  { %v1760_v21 = vmul.f32 %v3267_v47, %v4303_v32  ;;  %v3340_v52 = vpop.f32.mrb[44].mxu1  ;;  %v1704_v53 = vpop.f32.mrb[33].mxu0  ;;  %v1376_v32 = vmul.f32 0.17677669, %v1372_v61  ;;  %v3597_v47 = vld [vmem:[#allocation17 + $0x14] ss:$8 sps:$4 sm:$0xff]  }
 0x7af   :  { %v2079_v22 = vmul.f32 %v3340_v52, %v4331_v15  ;;  %v1759_v58 = vmul.f32 %v1704_v53, %v4305_v35  ;;  %v2055_v23 = vpop.f32.mrb[45].mxu1  ;;  %v3598_v52 = vld [vmem:[#allocation17 + $0x20] ss:$8 sps:$4 sm:$0xff]   ;;  %v3601_v53 = vld [vmem:[#allocation17 + $0x30] ss:$8 sps:$4 sm:$0xff]  }
 0x7b0   :  { %v2078_v60 = vmul.f32 %v2055_v23, %v4333_v16  ;;  %v3604_v23 = vld [vmem:[#allocation17 + $0x40] ss:$8 sps:$4 sm:$0xff]   ;;  %v3612_v61 = vld [vmem:[#allocation17 + $0x64] ss:$8 sps:$4 sm:$0xff]  }
 0x7b1   :  { %v3454_v48 = vpack.c.bf16 %v1760_v21, %v1759_v58  ;;  %v3595_v21 = vld [vmem:[#allocation17 + $0x10] ss:$8 sps:$4 sm:$0xff]   ;;  %v3606_v58 = vld [vmem:[#allocation17 + $0x44] ss:$8 sps:$4 sm:$0xff]  }
 0x7b2   :  { %v3490_v24 = vpack.c.bf16 %v2079_v22, %v2078_v60  ;;  %v3603_v22 = vld [vmem:[#allocation17 + $0x34] ss:$8 sps:$4 sm:$0xff]   ;;  %v3607_v60 = vld [vmem:[#allocation17 + $0x50] ss:$8 sps:$4 sm:$0xff]  }
 0x7b3   :  { %3455 = vmatpush3.bf16.msra.mxu0 %v3454_v48  ;;  %v3610_v48 = vld [vmem:[#allocation17 + $0x60] ss:$8 sps:$4 sm:$0xff]  }
 0x7b4   :  { %3491 = vmatpush3.bf16.msra.mxu1 %v3490_v24  ;;  %3456 = vmatprep.subr.bf16.mxu0 %v3940_v4  ;;  %v3615_v24 = vld [vmem:[#allocation17 + $0x74] ss:$8 sps:$4 sm:$0xff]  }
 0x7b5   :  { %v3270_v59 = vpop.f32.mrb[34].mxu0  ;;  %2414 = vmatprep.subr.bf16.mxu1 %v3594_v41  ;;  %v3631_v41 = vld [vmem:[#allocation19 + $0x38] sm:$0xff]  }
 0x7b6   :  { %v1762_v63 = vmul.f32 %v3270_v59, %v4310_v43  ;;  %v1714_v35 = vpop.f32.mrb[35].mxu0  ;;  %v3616_v59 = vld [vmem:[#allocation19 + $0x40] sm:$0xff]  }
 0x7b7   :  { %v1761_v3 = vmul.f32 %v1714_v35, %v4312_v46  ;;  %3374 = vmatmul.mubr.f32.vlgmr.msra.gmra.mrb[46].mxu1 %v1376_v32  ;;  %v3613_v32 = vld [vmem:[#allocation17 + $0x70] ss:$8 sps:$4 sm:$0xff]   ;;  %v3618_v35 = vld [vmem:[#allocation19 + $0x48] sm:$0xff]  }
 0x7b8   :  { %2446 = vmatprep.mubr.bf16.mxu1 %v3937_v0 }
 0x7b9   :  { %v3457_v7 = vpack.c.bf16 %v1762_v63, %v1761_v3  ;;  %v3617_v63 = vld [vmem:[#allocation19] sm:$0xff]   ;;  %v3619_v3 = vld [vmem:[#allocation19 + $0x8] sm:$0xff]  }
 0x7bb   :  { %3458 = vmatpush3.bf16.msra.mxu0 %v3457_v7  ;;  %v3620_v7 = vld [vmem:[#allocation19 + $0x50] sm:$0xff]  }
 0x7bc   :  { %3459 = vmatprep.subr.bf16.mxu0 %v3940_v4 }
 0x7bd   :  { %v3273_v40 = vpop.f32.mrb[36].mxu0 }
 0x7be   :  { %v1764_v8 = vmul.f32 %v3273_v40, %v4317_v54  ;;  %v1724_v9 = vpop.f32.mrb[37].mxu0  ;;  %v3621_v40 = vld [vmem:[#allocation19 + $0x10] sm:$0xff]  }
 0x7bf   :  { %v1763_v49 = vmul.f32 %v1724_v9, %v4319_v55  ;;  %v3623_v9 = vld [vmem:[#allocation19 + $0x18] sm:$0xff]  }
 0x7c1   :  { %v3460_v10 = vpack.c.bf16 %v1764_v8, %v1763_v49  ;;  %v3622_v8 = vld [vmem:[#allocation19 + $0x58] sm:$0xff]   ;;  %v3624_v49 = vld [vmem:[#allocation19 + $0x60] sm:$0xff]  }
 0x7c3   :  { %3461 = vmatpush3.bf16.msra.mxu0 %v3460_v10  ;;  %v3625_v10 = vld [vmem:[#allocation19 + $0x20] sm:$0xff]  }
 0x7c4   :  { %3462 = vmatprep.subr.bf16.mxu0 %v3940_v4 }
 0x7c5   :  { %v3276_v43 = vpop.f32.mrb[38].mxu0 }
 0x7c6   :  { %v1766_v46 = vmul.f32 %v3276_v43, %v4324_v62  ;;  %v1734_v11 = vpop.f32.mrb[39].mxu0  ;;  %v3584_v62 = vld [vmem:[#allocation16] sm:$0xff]   ;;  %v3626_v43 = vld [vmem:[#allocation19 + $0x68] sm:$0xff]  }
 0x7c7   :  { %v1765_v0 = vmul.f32 %v1734_v11, %v4326_v2  ;;  %v3586_v2 = vld [vmem:[#allocation16 + $0x10] sm:$0xff]  }
 0x7c9   :  { %v3463_v17 = vpack.c.bf16 %v1766_v46, %v1765_v0 }
 0x7cb   :  { %3464 = vmatpush3.bf16.msra.mxu0 %v3463_v17 }
 0x7cc   :  { %3465 = vmatprep.subr.bf16.mxu0 %v3940_v4  ;;  %v3585_v4 = vld [vmem:[#allocation16 + $0x8] sm:$0xff]  }
 0x7cd   :  { %v3279_v18 = vpop.f32.mrb[40].mxu0 }
 0x7ce   :  { %v1768_v54 = vmul.f32 %v3279_v18, %v4331_v15  ;;  %v1744_v20 = vpop.f32.mrb[41].mxu0  ;;  %v3587_v15 = vld [vmem:[#allocation16 + $0x18] sm:$0xff]  }
 0x7cf   :  { %v1767_v55 = vmul.f32 %v1744_v20, %v4333_v16  ;;  %v3588_v16 = vld [vmem:[#allocation16 + $0x20] sm:$0xff]  }
 0x7d1   :  { %v3466_v27 = vpack.c.bf16 %v1768_v54, %v1767_v55 }
 0x7d3   :  { %3467 = vmatpush3.bf16.msra.mxu0 %v3466_v27 }
 0x7d4   :  { %3376 = vmatprep.subr.bf16.mxu0 %v3938_v1 }
 0x7d6   :  { %3313 = vmatmul.mubr.f32.vlgmr.msra.gmra.mrb[42].mxu0 %v1375_v5 }
 0x7d7   :  { %3392 = vmatprep.mubr.msk.bf16.mxu0 %vm3939_vm0, %v3938_v1  ;;  %3377 = vmatpush3.bf16.msra.mxu0 %v3584_v62 }
 0x7d8   :  { %3378 = vmatprep.subr.bf16.mxu0 %v3938_v1 }
 0x7db   :  { %3379 = vmatpush3.bf16.msra.mxu0 %v3585_v4 }
 0x7dc   :  { %3380 = vmatprep.subr.bf16.mxu0 %v3938_v1 }
 0x7df   :  { %3381 = vmatpush3.bf16.msra.mxu0 %v3586_v2 }
 0x7e0   :  { %3382 = vmatprep.subr.bf16.mxu0 %v3938_v1 }
 0x7e3   :  { %3383 = vmatpush3.bf16.msra.mxu0 %v3587_v15  ;;  %v2841_v15 = vld [vmem:[%s4600_s13 + $0x4] ss:$0 sm:$0xff] }
 0x7e4   :  { %3384 = vmatprep.subr.bf16.mxu0 %v3938_v1 }
 0x7e7   :  { %3385 = vmatpush3.bf16.msra.mxu0 %v3588_v16 }
 0x7e8   :  { %3386 = vmatprep.subr.bf16.mxu0 %v3938_v1 }
 0x7eb   :  { %3387 = vmatpush3.bf16.msra.mxu0 %v3589_v51 }
 0x7ec   :  { %3388 = vmatprep.subr.bf16.mxu0 %v3938_v1 }
 0x7ef   :  { %3389 = vmatpush3.bf16.msra.mxu0 %v3590_v28 }
 0x7f0   :  { %3390 = vmatprep.subr.bf16.mxu0 %v3938_v1 }
 0x7f3   :  { %3391 = vmatpush3.bf16.msra.mxu0 %v3591_v29 }
 0x7f4   :  { %3050 = vmatprep.subr.bf16.mxu0 %v3616_v59 }
 0x88a   :  { %v2146_v6 = vpop.f32.mrb[46].mxu1 }
 0x88b   :  { %v3375_v30 = vpop.f32.mrb[47].mxu1 }
 0x8a9   :  { %v1835_v36 = vpop.f32.mrb[42].mxu0 }
 0x8aa   :  { %v2150_v44 = vpack.c.bf16 %v2146_v6, %v1835_v36  ;;  %v3314_v45 = vpop.f32.mrb[43].mxu0  ;;  %v2842_v6 = vld [vmem:[%s4600_s13 + $0x5] ss:$0 sm:$0xff] }
 0x8ac   :  { %3393 = vmatmul.mubr.bf16.vlgmr.msra.gmra.mrb[44].mxu0 %v2150_v44 }
 0x8ad   :  { %3051 = vmatpush3.bf16.msra.mxu0 %v3617_v63 }
 0x8ae   :  { %3052 = vmatprep.subr.bf16.mxu0 %v3618_v35 }
 0x8b1   :  { %3053 = vmatpush3.bf16.msra.mxu0 %v3619_v3 }
 0x8b2   :  { %3054 = vmatprep.subr.bf16.mxu0 %v3620_v7 }
 0x8b5   :  { %3055 = vmatpush3.bf16.msra.mxu0 %v3621_v40 }
 0x8b6   :  { %3056 = vmatprep.subr.bf16.mxu0 %v3622_v8 }
 0x8b9   :  { %3057 = vmatpush3.bf16.msra.mxu0 %v3623_v9 }
 0x8ba   :  { %3058 = vmatprep.subr.bf16.mxu0 %v3624_v49 }
 0x8bd   :  { %3059 = vmatpush3.bf16.msra.mxu0 %v3625_v10 }
 0x8be   :  { %3060 = vmatprep.subr.bf16.mxu0 %v3626_v43 }
 0x97f   :  { %v2254_v12 = vpop.f32.mrb[44].mxu0 }
 0x980   :  { %v2255_v13 = vadd.f32 %v2832_v42, %v2254_v12  ;;  %v3394_v19 = vpop.f32.mrb[45].mxu0 }
 0x981   :  { %v2257_v26 = vpop.f32.mrb[46].mxu0 }
 0x982   :  { %v4539_v14 = vadd.f32 %v2255_v13, %v4430_v56  ;;  %v2258_v1 = vadd.f32 %v2832_v42, %v2257_v26  ;;  %v3395_v34 = vpop.f32.mrb[47].mxu0  ;;  %v3592_v56 = vld [vmem:[#allocation17] ss:$8 sps:$4 sm:$0xff]  }
 0x983   :  { %2415 = vmatpush1.bf16.msra.mxu1 %v3592_v56  ;;  %v3628_v34 = vld [vmem:[#allocation19 + $0x70] sm:$0xff]  }
 0x984   :  { %v4542_v37 = vadd.f32 %v2258_v1, %v4432_v57  ;;  %2263 = vadd.xlane.f32.xlu1 %v4539_v14  ;;  %v2269_v38 = vmul.f32 %v4539_v14, %v4539_v14  ;;  %2416 = vmatprep.subr.bf16.mxu1 %v3597_v47  ;;  %v3600_v57 = vld [vmem:[#allocation17 + $0x24] ss:$8 sps:$4 sm:$0xff]  }
 0x985   :  { %v3627_v1 = vld [vmem:[#allocation19 + $0x28] sm:$0xff]  }
 0x986   :  { %2265 = vadd.xlane.f32.xlu0 %v4542_v37  ;;  %v2270_v39 = vmul.f32 %v4542_v37, %v4542_v37  ;;  %3061 = vmatpush3.bf16.msra.mxu0 %v3627_v1 }
 0x987   :  { %2417 = vmatpush1.bf16.msra.mxu1 %v3595_v21  ;;  %3062 = vmatprep.subr.bf16.mxu0 %v3628_v34 }
 0x988   :  { %2271 = vadd.xlane.f32.xlu1 %v2269_v38  ;;  %2418 = vmatprep.subr.bf16.mxu1 %v3600_v57  ;;  %v3629_v38 = vld [vmem:[#allocation19 + $0x30] sm:$0xff]  }
 0x98a   :  { %3063 = vmatpush3.bf16.msra.mxu0 %v3629_v38 }
 0x98b   :  { %2419 = vmatpush1.bf16.msra.mxu1 %v3598_v52 }
 0x98c   :  { %2273 = vadd.xlane.f32.xlu1 %v2270_v39  ;;  %2420 = vmatprep.subr.bf16.mxu1 %v3603_v22  ;;  %v3630_v39 = vld [vmem:[#allocation19 + $0x78] sm:$0xff]  }
 0x98d   :  { %3064 = vmatprep.subr.bf16.mxu0 %v3630_v39 }
 0x98e   :  { %3065 = vmatpush3.bf16.msra.mxu0 %v3631_v41 }
 0x98f   :  { %2421 = vmatpush1.bf16.msra.mxu1 %v3601_v53 }
 0x990   :  { %2422 = vmatprep.subr.bf16.mxu1 %v3606_v58 }
 0x993   :  { %2423 = vmatpush1.bf16.msra.mxu1 %v3604_v23 }
 0x994   :  { %2424 = vmatprep.subr.bf16.mxu1 %v3609_v50 }
 0x997   :  { %2425 = vmatpush1.bf16.msra.mxu1 %v3607_v60 }
 0x998   :  { %2426 = vmatprep.subr.bf16.mxu1 %v3612_v61 }
 0x99b   :  { %2427 = vmatpush1.bf16.msra.mxu1 %v3610_v48 }
 0x99c   :  { %2428 = vmatprep.subr.bf16.mxu1 %v3615_v24 }
 0x99f   :  { %2429 = vmatpush1.bf16.msra.mxu1 %v3613_v32 }
 0xa11   :  { %v2264_v46 = vpop.xlane.xlu1 %2263 }
 0xa12   :  { %v2267_v11 = vmul.f32 0.0078125, %v2264_v46 }
 0xa13   :  { %v2266_v0 = vpop.xlane.xlu0 %2265 }
 0xa14   :  { %v2277_v18 = vmul.f32 %v2267_v11, %v2267_v11  ;;  %v2268_v54 = vmul.f32 0.0078125, %v2266_v0 }
 0xa15   :  { %v2272_v17 = vpop.xlane.xlu1 %2271 }
 0xa16   :  { %v2275_v20 = vmul.f32 0.0078125, %v2272_v17  ;;  %v2278_v27 = vmul.f32 %v2268_v54, %v2268_v54 }
 0xa18   :  { %v2279_v55 = vsub.f32 %v2275_v20, %v2277_v18 }
 0xa19   :  { %v2274_v25 = vpop.xlane.xlu1 %2273 }
 0xa1a   :  { %v2281_v5 = vadd.f32 1e-05, %v2279_v55  ;;  %v2276_v62 = vmul.f32 0.0078125, %v2274_v25 }
 0xa1c   :  { %3636 = vrsqrt.f32 %v2281_v5  ;;  %v2280_v4 = vsub.f32 %v2276_v62, %v2278_v27 }
 0xa1e   :  { %v2282_v2 = vadd.f32 1e-05, %v2280_v4 }
 0xa20   :  { %3638 = vrsqrt.f32 %v2282_v2 }
 0xa26   :  { %v3637_v16 = vpop.eup %3636 }
 0xa27   :  { %v2290_v51 = vmul.f32 %v3637_v16, %v2841_v15 }
 0xa29   :  { %v2295_v28 = vmul.f32 %v2290_v51, %v2267_v11  ;;  %v2292_v45 = vmul.f32 %v2290_v51, %v4539_v14  ;;  %v2322_v14 = vld [vmem:[%s4599_s12] sm:$0x3] }
 0xa2a   :  { %v3639_v29 = vpop.eup %3638  ;;  %v2331_v56 = vrot.slane %v2322_v14, %v4241_v33 }
 0xa2b   :  { %v2291_v30 = vmul.f32 %v3639_v29, %v2841_v15  ;;  %v2301_v44 = vsub.f32 %v2842_v6, %v2295_v28  ;;  %v2876_v15 = vld [vmem:[%s4600_s13 + $0x7] ss:$0 sm:$0xff]  ;;  %v2877_v28 = vld [vmem:[%s4600_s13 + $0x8] ss:$0 sm:$0xff] }
 0xa2d   :  { %v2296_v36 = vmul.f32 %v2291_v30, %v2268_v54  ;;  %v2293_v42 = vmul.f32 %v2291_v30, %v4542_v37  ;;  %v2303_v13 = vadd.f32 %v2301_v44, %v2292_v45  ;;  %v2327_v37 = vrot.slane %v2322_v14, %v4236_v31  ;;  %v2859_v31 = vld [vmem:[%s4600_s13 + $0x6] ss:$0 sm:$0xff] }
 0xa2f   :  { %v2302_v12 = vsub.f32 %v2842_v6, %v2296_v36 }
 0xa31   :  { %v2304_v19 = vadd.f32 %v2302_v12, %v2293_v42 }
 0xa33   :  { %v2305_v26 = vpack.c.bf16 %v2304_v19, %v2303_v13 }
 0xa35   :  { %2447 = vmatmul.mubr.bf16.vlgmr.msra.gmra.mrb[48].mxu1 %v2305_v26 }
 0xb08   :  { %v2448_v47 = vpop.f32.mrb[48].mxu1 }
 0xb09   :  { %v2449_v21 = vadd.f32 %v2448_v47, %v2327_v37  ;;  %v2450_v57 = vpop.f32.mrb[49].mxu1 }
 0xb0a   :  { %v2451_v52 = vadd.f32 %v2450_v57, %v2331_v56  ;;  %v2452_v53 = vpop.f32.mrb[50].mxu1 }
 0xb0b   :  { %v2453_v22 = vadd.f32 %v2452_v53, %v2327_v37  ;;  %v2454_v58 = vpop.f32.mrb[51].mxu1  ;;  %v2457_v50 = vmax.f32 %v2449_v21, 0.0 }
 0xb0c   :  { %v2455_v23 = vadd.f32 %v2454_v58, %v2331_v56  ;;  %v2458_v61 = vmax.f32 %v2451_v52, 0.0 }
 0xb0d   :  { %v2459_v60 = vmax.f32 %v2453_v22, 0.0 }
 0xb0e   :  { %v2460_v48 = vmax.f32 %v2455_v23, 0.0 }
 0xb0f   :  { %v2461_v24 = vpack.c.bf16 %v2459_v60, %v2457_v50 }
 0xb10   :  { %v2462_v32 = vpack.c.bf16 %v2460_v48, %v2458_v61 }
 0xb12   :  { %2628 = vmatprep.mubr.bf16.mxu0 %v2462_v32 }
 0xb13   :  { %2629 = vmatmul.mubr.bf16.vlgmr.msra.gmra.mrb[48].mxu0 %v2461_v24 }
 0xbe6   :  { %v3066_v59 = vpop.f32.mrb[48].mxu0 }
 0xbe7   :  { %v3067_v33 = vpop.f32.mrb[49].mxu0 }
 0xbe8   :  { %v3068_v63 = vadd.f32 %v3067_v33, %v3066_v59  ;;  %v3069_v35 = vpop.f32.mrb[50].mxu0 }
 0xbe9   :  { %v3070_v3 = vpop.f32.mrb[51].mxu0 }
 0xbea   :  { %v2631_v7 = vadd.f32 %v3068_v63, %v2859_v31  ;;  %v3071_v40 = vadd.f32 %v3070_v3, %v3069_v35 }
 0xbec   :  { %v2634_v8 = vadd.f32 %v3071_v40, %v2859_v31  ;;  %v2637_v9 = vadd.f32 %v2631_v7, %v2303_v13 }
 0xbee   :  { %2639 = vadd.xlane.f32.xlu1 %v2637_v9  ;;  %v2638_v49 = vadd.f32 %v2634_v8, %v2304_v19  ;;  %v2645_v10 = vmul.f32 %v2637_v9, %v2637_v9 }
 0xbf0   :  { %v2646_v43 = vmul.f32 %v2638_v49, %v2638_v49 }
 0xbf2   :  { %2641 = vadd.xlane.f32.xlu1 %v2638_v49 }
 0xbf6   :  { %2647 = vadd.xlane.f32.xlu1 %v2645_v10 }
 0xbfa   :  { %2649 = vadd.xlane.f32.xlu1 %v2646_v43 }
 0xc7b   :  { %v2640_v46 = vpop.xlane.xlu1 %2639 }
 0xc7c   :  { %v2643_v0 = vmul.f32 0.0078125, %v2640_v46 }
 0xc7e   :  { %v2653_v18 = vmul.f32 %v2643_v0, %v2643_v0 }
 0xc7f   :  { %v2642_v11 = vpop.xlane.xlu1 %2641 }
 0xc80   :  { %v2644_v54 = vmul.f32 0.0078125, %v2642_v11 }
 0xc82   :  { %v2654_v27 = vmul.f32 %v2644_v54, %v2644_v54 }
 0xc83   :  { %v2648_v17 = vpop.xlane.xlu1 %2647 }
 0xc84   :  { %v2651_v20 = vmul.f32 0.0078125, %v2648_v17 }
 0xc86   :  { %v2655_v55 = vsub.f32 %v2651_v20, %v2653_v18 }
 0xc87   :  { %v2650_v25 = vpop.xlane.xlu1 %2649 }
 0xc88   :  { %v2657_v5 = vadd.f32 1e-05, %v2655_v55  ;;  %v2652_v62 = vmul.f32 0.0078125, %v2650_v25 }
 0xc8a   :  { %3640 = vrsqrt.f32 %v2657_v5  ;;  %v2656_v4 = vsub.f32 %v2652_v62, %v2654_v27 }
 0xc8c   :  { %v2658_v2 = vadd.f32 1e-05, %v2656_v4 }
 0xc8e   :  { %3642 = vrsqrt.f32 %v2658_v2 }
 0xc94   :  { %v3641_v16 = vpop.eup %3640 }
 0xc95   :  { %v2666_v51 = vmul.f32 %v3641_v16, %v2876_v15 }
 0xc97   :  { %v2671_v29 = vmul.f32 %v2666_v51, %v2643_v0  ;;  %v2668_v36 = vmul.f32 %v2666_v51, %v2637_v9 }
 0xc98   :  { %v3643_v6 = vpop.eup %3642 }
 0xc99   :  { %v2667_v30 = vmul.f32 %v3643_v6, %v2876_v15  ;;  %v2677_v44 = vsub.f32 %v2877_v28, %v2671_v29 }
 0xc9b   :  { %v2672_v45 = vmul.f32 %v2667_v30, %v2644_v54  ;;  %v2679_v42 = vadd.f32 %v2677_v44, %v2668_v36  ;;  %v2669_v12 = vmul.f32 %v2667_v30, %v2638_v49 }
 0xc9d   :  { %v2678_v13 = vsub.f32 %v2877_v28, %v2672_v45  ;;  %2681 = vst [vmem:[#allocation20] sm:$0xff] %v2679_v42 }
 0xc9f   :  { %v2680_v19 = vadd.f32 %v2678_v13, %v2669_v12 }
 0xca1   :  { %2682 = vst [vmem:[#allocation20 + $0x8] sm:$0xff] %v2680_v19 }
 0xca2   :  { %3897 = shalt.err (!%p3894_p8)
}
 0xca3   :  { %s3898_s15 = scalar_lea.hbm %s4601_s14, 256 }
 0xca4   :  { %p3899_p9 = scmp.ne.s32.totalorder %s4601_s14, %s3898_s15  ;;  %p3902_p10 = scmp.lt.u32.totalorder %s3898_s15, %s4601_s14 }
 0xca6   :  { %p3904_p11 = pnand %p3902_p10, %p3899_p9 }
 0xca8   :  { %3907 = shalt.err (!%p3904_p11)
}
 0xca9   :  { %2694 = dma.vmem_to_hbm [thread:$0]  %s2689_s30, 256, %s4601_s14, [#allocation4], %s4604_s5, %s4604_s5, %s3925_s26  }
 0xcaa   :  { %3920 = dma.done.wait [#allocation4], 256  }
 0xcab   :  { %3921 = vsyncadd [#allocation4], 4294967040 }
 0xcac   :  { %2698 = vsyncpa [#allocation3], 1 }
 0xcad   :  { %2699 = vsyncpa [#allocation6], 1 }
 0xcae   :  { %2700 = vsyncpa [#allocation9], 1 }
 0xcaf   :  { %2701 = vsyncpa [#allocation12], 1 }
 0xcb0   :  { %2702 = vsyncpa [#allocation15], 1 }
 0xcb1   :  { %2703 = vsyncpa [#allocation18], 1 }
 0xcb2   :  { %2704 = vsyncpa [#allocation4], 1 }

</bundles_post_ra>
